<compile_context>
chip_gen: v6e
topology: v6e:2x2x1
jax: 0.10.0
libtpu: 0.0.40
codegen_flags: <defaults>
</compile_context>

<pallas_src>
import functools

import jax
import jax.numpy as jnp
from jax import lax
from jax.experimental import pallas as pl
from jax.experimental.pallas import tpu as pltpu


def _make_lstm_kernel(num_layers: int, seq_len: int, batch_pad: int, hidden: int):
    """Build the kernel body for a fixed (static) configuration."""
    H, B, T, L = hidden, batch_pad, seq_len, num_layers
    G = 4 * H  # gate width per layer

    def kernel(x_ref, w_ih0_ref, w_block_ref, bias_ref, fc_w_ref, fc_b_ref,
               out_ref, xp_ref):
        # Hoisted constants: g-gate lane mask + per-lane pre-scale for the
        # single-tanh sigmoid trick (sigmoid(x) = 0.5*(1 + tanh(x/2))).
        col = lax.broadcasted_iota(jnp.int32, (1, G), 1)
        g_mask = jnp.logical_and(col >= 2 * H, col < 3 * H)
        gate_scale = jnp.where(g_mask, 1.0, 0.5).astype(jnp.float32)

        # Layer-0 input-side projection for all T timesteps in ONE matmul,
        # written once to VMEM scratch (bias for layer 0 lives in bias_ref).
        xp_ref[...] = jnp.dot(x_ref[...], w_ih0_ref[...],
                              preferred_element_type=jnp.float32)

        bias_row = bias_ref[...]  # (1, L*G) f32, pre-summed b_ih + b_hh

        h_parts = [jnp.zeros((B, H), jnp.float32) for _ in range(L)]
        c_parts = [jnp.zeros((B, H), jnp.float32) for _ in range(L)]

        # Fully-unrolled wavefront: T + L - 1 serial steps, one combined
        # recurrent matmul per step (layer l handles timestep t = s - l).
        for s in range(T + L - 1):
            hcat = h_parts[0] if L == 1 else jnp.concatenate(h_parts, axis=1)
            gates_all = jnp.dot(hcat, w_block_ref[...],
                                preferred_element_type=jnp.float32) + bias_row
            for l in range(L):
                t = s - l
                if 0 <= t < T:
                    g = gates_all[:, l * G:(l + 1) * G]
                    if l == 0:
                        # Aligned static row slice of the precomputed xproj.
                        g = g + xp_ref[t * B:(t + 1) * B, :]
                    y = jnp.tanh(g * gate_scale)            # one EUP pass
                    act = jnp.where(g_mask, y, 0.5 + 0.5 * y)
                    i_g = act[:, 0 * H:1 * H]
                    f_g = act[:, 1 * H:2 * H]
                    g_g = act[:, 2 * H:3 * H]
                    o_g = act[:, 3 * H:4 * H]
                    c_parts[l] = f_g * c_parts[l] + i_g * g_g
                    h_parts[l] = o_g * jnp.tanh(c_parts[l])  # second EUP pass

        # Final-timestep hidden state of the last layer -> FC.
        out_ref[...] = (
            jnp.dot(h_parts[L - 1], fc_w_ref[...],
                    preferred_element_type=jnp.float32)
            + fc_b_ref[...]
        )

    return kernel


def prepare_params(params, *, hidden_size, num_layers):
    """One-time weight formatting (hoisted out of the per-call wrapper)."""
    H, L = hidden_size, num_layers
    G = 4 * H

    w_ih0, _, _, _ = params["lstm"][0]
    w_ih0_t = jnp.asarray(w_ih0, jnp.float32).T              # (I, 4H)

    w_block = jnp.zeros((L * H, L * G), jnp.float32)
    bias = jnp.zeros((1, L * G), jnp.float32)
    for l in range(L):
        w_ih, w_hh, b_ih, b_hh = params["lstm"][l]
        w_block = w_block.at[l * H:(l + 1) * H, l * G:(l + 1) * G].set(
            jnp.asarray(w_hh, jnp.float32).T)                # W_hh_l^T on diag
        if l >= 1:
            w_block = w_block.at[(l - 1) * H:l * H, l * G:(l + 1) * G].set(
                jnp.asarray(w_ih, jnp.float32).T)            # W_ih_l^T above
        bias = bias.at[0, l * G:(l + 1) * G].set(
            jnp.asarray(b_ih, jnp.float32) + jnp.asarray(b_hh, jnp.float32))

    fc_w, fc_b = params["fc"]
    return {
        "w_ih0_t": w_ih0_t,
        "w_block": w_block,
        "bias": bias,
        "fc_w_t": jnp.asarray(fc_w, jnp.float32).T,          # (H, O)
        "fc_b_row": jnp.asarray(fc_b, jnp.float32)[None, :], # (1, O)
    }


def lstm_model_forward(x, prepared, *, hidden_size, num_layers, output_size):
    """x: (B, T, input_size) batch-first, like the PyTorch module."""
    B, T, I = x.shape
    H, L, O = hidden_size, num_layers, output_size
    B_pad = ((B + 7) // 8) * 8  # f32 sublane tile

    # Batch-first (B,T,I) -> time-major, batch padded to the sublane tile,
    # flattened (T*B_pad, I).  Padded rows never affect real rows.
    xt = jnp.transpose(x, (1, 0, 2)).astype(jnp.float32)     # (T, B, I)
    if B_pad != B:
        xt = jnp.pad(xt, ((0, 0), (0, B_pad - B), (0, 0)))
    x2d = xt.reshape(T * B_pad, I)

    vmem_spec = pl.BlockSpec(memory_space=pltpu.MemorySpace.VMEM)
    kernel = _make_lstm_kernel(L, T, B_pad, H)

    out_pad = pl.pallas_call(
        kernel,
        out_shape=jax.ShapeDtypeStruct((B_pad, O), jnp.float32),
        in_specs=[vmem_spec] * 6,
        out_specs=vmem_spec,
        scratch_shapes=[pltpu.VMEM((T * B_pad, 4 * H), jnp.float32)],
        compiler_params=pltpu.CompilerParams(
            # Working set is well under 1 MiB; document the VMEM contract so
            # behavior matches across v5e/v6e/v7x scoped limits.
            vmem_limit_bytes=16 * 1024 * 1024,
        ),
    )(x2d, prepared["w_ih0_t"], prepared["w_block"], prepared["bias"],
      prepared["fc_w_t"], prepared["fc_b_row"])
    return out_pad[:B]


def init_params(key, input_size, hidden_size, num_layers, output_size):
    """Deterministic parameter init matching PyTorch shapes."""
    H = hidden_size
    k = 1.0 / jnp.sqrt(H)
    params = {"lstm": [], "fc": None}
    for l in range(num_layers):
        in_l = input_size if l == 0 else H
        key, k1, k2, k3, k4 = jax.random.split(key, 5)
        w_ih = jax.random.uniform(k1, (4 * H, in_l), jnp.float32, -k, k)
        w_hh = jax.random.uniform(k2, (4 * H, H), jnp.float32, -k, k)
        b_ih = jax.random.uniform(k3, (4 * H,), jnp.float32, -k, k)
        b_hh = jax.random.uniform(k4, (4 * H,), jnp.float32, -k, k)
        params["lstm"].append((w_ih, w_hh, b_ih, b_hh))
    key, k1, k2 = jax.random.split(key, 3)
    kf = 1.0 / jnp.sqrt(H)
    fc_w = jax.random.uniform(k1, (output_size, H), jnp.float32, -kf, kf)
    fc_b = jax.random.uniform(k2, (output_size,), jnp.float32, -kf, kf)
    params["fc"] = (fc_w, fc_b)
    return params


def reference_forward(x, params, *, hidden_size, num_layers, output_size):
    """Pure-JAX f32 reference replicating torch.nn.LSTM + Linear semantics."""
    B, T, _ = x.shape
    H, L = hidden_size, num_layers
    seq = x.astype(jnp.float32)
    for l in range(L):
        w_ih, w_hh, b_ih, b_hh = params["lstm"][l]
        h = jnp.zeros((B, H), jnp.float32)
        c = jnp.zeros((B, H), jnp.float32)
        outs = []
        for t in range(T):
            gates = seq[:, t, :] @ w_ih.T + b_ih + h @ w_hh.T + b_hh
            i_g = jax.nn.sigmoid(gates[:, 0 * H:1 * H])
            f_g = jax.nn.sigmoid(gates[:, 1 * H:2 * H])
            g_g = jnp.tanh(gates[:, 2 * H:3 * H])
            o_g = jax.nn.sigmoid(gates[:, 3 * H:4 * H])
            c = f_g * c + i_g * g_g
            h = o_g * jnp.tanh(c)
            outs.append(h)
        seq = jnp.stack(outs, axis=1)
    fc_w, fc_b = params["fc"]
    return seq[:, -1, :] @ fc_w.T + fc_b


if __name__ == "__main__":
    # Small, deterministic configuration.
    batch, seq_len = 4, 8
    input_size, hidden_size, num_layers, output_size = 16, 32, 2, 8

    key = jax.random.PRNGKey(0)
    key, xk = jax.random.split(key)
    x = jax.random.normal(xk, (batch, seq_len, input_size), jnp.float32)

    params = init_params(key, input_size, hidden_size, num_layers, output_size)
    prepared = prepare_params(params, hidden_size=hidden_size,
                              num_layers=num_layers)

    fwd = jax.jit(functools.partial(
        lstm_model_forward,
        hidden_size=hidden_size,
        num_layers=num_layers,
        output_size=output_size,
    ))
    out = jax.block_until_ready(fwd(x, prepared))

    ref = reference_forward(
        x, params,
        hidden_size=hidden_size,
        num_layers=num_layers,
        output_size=output_size,
    )
    assert out.shape == (batch, output_size)
    assert jnp.allclose(out, ref, rtol=5e-2, atol=5e-2), "mismatch vs reference"

    print("KERNEL_OK")
</pallas_src>

<mosaic_0001>
module attributes {stable_mosaic.version = 11 : i64} {
  func.func @kernel(%arg0: memref<64x16xf32, #tpu.memory_space<vmem>>, %arg1: memref<16x128xf32, #tpu.memory_space<vmem>>, %arg2: memref<64x256xf32, #tpu.memory_space<vmem>>, %arg3: memref<1x256xf32, #tpu.memory_space<vmem>>, %arg4: memref<32x8xf32, #tpu.memory_space<vmem>>, %arg5: memref<1x8xf32, #tpu.memory_space<vmem>>, %arg6: memref<8x8xf32, #tpu.memory_space<vmem>>, %arg7: memref<64x128xf32, #tpu.memory_space<vmem>>) attributes {dimension_semantics = [], scalar_prefetch = 0 : i64, scratch_operands = 1 : i64, tpu.core_type = #tpu.core_type<tc>} {
    %0 = tpu.iota {dimensions = array<i32: 1>} : vector<1x128xi32>
    %c64_i32 = arith.constant 64 : i32
    %1 = vector.broadcast %c64_i32 : i32 to vector<1x128xi32>
    %2 = arith.cmpi sge, %0, %1 : vector<1x128xi32>
    %c96_i32 = arith.constant 96 : i32
    %3 = vector.broadcast %c96_i32 : i32 to vector<1x128xi32>
    %4 = arith.cmpi slt, %0, %3 : vector<1x128xi32>
    %5 = arith.andi %2, %4 : vector<1x128xi1>
    %cst = arith.constant 1.000000e+00 : f32
    %cst_0 = arith.constant 5.000000e-01 : f32
    %6 = vector.broadcast %cst : f32 to vector<1x128xf32>
    %7 = vector.broadcast %cst_0 : f32 to vector<1x128xf32>
    %8 = arith.select %5, %6, %7 : vector<1x128xi1>, vector<1x128xf32>
    %c0 = arith.constant 0 : index
    %c0_1 = arith.constant 0 : index
    %9 = vector.load %arg0[%c0, %c0_1] : memref<64x16xf32, #tpu.memory_space<vmem>>, vector<64x16xf32>
    %c0_2 = arith.constant 0 : index
    %c0_3 = arith.constant 0 : index
    %10 = vector.load %arg1[%c0_2, %c0_3] : memref<16x128xf32, #tpu.memory_space<vmem>>, vector<16x128xf32>
    %cst_4 = arith.constant dense<0.000000e+00> : vector<64x128xf32>
    %11 = tpu.matmul %9, %10, %cst_4 {dimension_numbers = #tpu.dot_dimension_numbers<[1], [0], [0], [1], [0, 0, 1, 1], [], []>} : vector<64x16xf32>, vector<16x128xf32>, vector<64x128xf32> -> vector<64x128xf32>
    %c0_5 = arith.constant 0 : index
    %c0_6 = arith.constant 0 : index
    %12 = vector.load %arg7[%c0_5, %c0_6] : memref<64x128xf32, #tpu.memory_space<vmem>>, vector<64x128xf32>
    tpu.vector_store %arg7[%c0_5, %c0_6], %11 {strides = array<i32>} : memref<64x128xf32, #tpu.memory_space<vmem>>, vector<64x128xf32>,
    %c0_7 = arith.constant 0 : index
    %c0_8 = arith.constant 0 : index
    %13 = vector.load %arg3[%c0_7, %c0_8] : memref<1x256xf32, #tpu.memory_space<vmem>>, vector<1x256xf32>
    %cst_9 = arith.constant 0.000000e+00 : f32
    %14 = vector.broadcast %cst_9 : f32 to vector<8x32xf32>
    %cst_10 = arith.constant 0.000000e+00 : f32
    %15 = vector.broadcast %cst_10 : f32 to vector<8x32xf32>
    %cst_11 = arith.constant 0.000000e+00 : f32
    %16 = vector.broadcast %cst_11 : f32 to vector<8x32xf32>
    %cst_12 = arith.constant 0.000000e+00 : f32
    %17 = vector.broadcast %cst_12 : f32 to vector<8x32xf32>
    %18 = tpu.concatenate %14, %15 in 1 : vector<8x32xf32>, vector<8x32xf32> -> vector<8x64xf32>
    %c0_13 = arith.constant 0 : index
    %c0_14 = arith.constant 0 : index
    %19 = vector.load %arg2[%c0_13, %c0_14] : memref<64x256xf32, #tpu.memory_space<vmem>>, vector<64x256xf32>
    %cst_15 = arith.constant dense<0.000000e+00> : vector<8x256xf32>
    %20 = tpu.matmul %18, %19, %cst_15 {dimension_numbers = #tpu.dot_dimension_numbers<[1], [0], [0], [1], [0, 0, 1, 1], [], []>} : vector<8x64xf32>, vector<64x256xf32>, vector<8x256xf32> -> vector<8x256xf32>
    %21 = vector.broadcast %13 : vector<1x256xf32> to vector<8x256xf32>
    %22 = arith.addf %20, %21 : vector<8x256xf32>
    %23 = vector.extract_strided_slice %22 {offsets = [0, 0], sizes = [8, 128], strides = [1, 1]} : vector<8x256xf32> to vector<8x128xf32>
    %c0_16 = arith.constant 0 : index
    %c0_17 = arith.constant 0 : index
    %24 = vector.load %arg7[%c0_16, %c0_17] : memref<64x128xf32, #tpu.memory_space<vmem>>, vector<8x128xf32>
    %25 = arith.addf %23, %24 : vector<8x128xf32>
    %26 = vector.broadcast %8 : vector<1x128xf32> to vector<8x128xf32>
    %27 = arith.mulf %25, %26 : vector<8x128xf32>
    %28 = math.tanh %27 : vector<8x128xf32>
    %cst_18 = arith.constant 5.000000e-01 : f32
    %29 = vector.broadcast %cst_18 : f32 to vector<8x128xf32>
    %30 = arith.mulf %29, %28 : vector<8x128xf32>
    %cst_19 = arith.constant 5.000000e-01 : f32
    %31 = vector.broadcast %cst_19 : f32 to vector<8x128xf32>
    %32 = arith.addf %31, %30 : vector<8x128xf32>
    %33 = vector.shape_cast %5 : vector<1x128xi1> to vector<1x128xi1>
    %34 = vector.broadcast %33 : vector<1x128xi1> to vector<8x128xi1>
    %35 = arith.select %34, %28, %32 : vector<8x128xi1>, vector<8x128xf32>
    %36 = vector.extract_strided_slice %35 {offsets = [0, 0], sizes = [8, 32], strides = [1, 1]} : vector<8x128xf32> to vector<8x32xf32>
    %37 = vector.extract_strided_slice %35 {offsets = [0, 32], sizes = [8, 32], strides = [1, 1]} : vector<8x128xf32> to vector<8x32xf32>
    %38 = vector.extract_strided_slice %35 {offsets = [0, 64], sizes = [8, 32], strides = [1, 1]} : vector<8x128xf32> to vector<8x32xf32>
    %39 = vector.extract_strided_slice %35 {offsets = [0, 96], sizes = [8, 32], strides = [1, 1]} : vector<8x128xf32> to vector<8x32xf32>
    %40 = arith.mulf %37, %16 : vector<8x32xf32>
    %41 = arith.mulf %36, %38 : vector<8x32xf32>
    %42 = arith.addf %40, %41 : vector<8x32xf32>
    %43 = math.tanh %42 : vector<8x32xf32>
    %44 = arith.mulf %39, %43 : vector<8x32xf32>
    %45 = tpu.concatenate %44, %15 in 1 : vector<8x32xf32>, vector<8x32xf32> -> vector<8x64xf32>
    %c0_20 = arith.constant 0 : index
    %c0_21 = arith.constant 0 : index
    %46 = vector.load %arg2[%c0_20, %c0_21] : memref<64x256xf32, #tpu.memory_space<vmem>>, vector<64x256xf32>
    %cst_22 = arith.constant dense<0.000000e+00> : vector<8x256xf32>
    %47 = tpu.matmul %45, %46, %cst_22 {dimension_numbers = #tpu.dot_dimension_numbers<[1], [0], [0], [1], [0, 0, 1, 1], [], []>} : vector<8x64xf32>, vector<64x256xf32>, vector<8x256xf32> -> vector<8x256xf32>
    %48 = vector.broadcast %13 : vector<1x256xf32> to vector<8x256xf32>
    %49 = arith.addf %47, %48 : vector<8x256xf32>
    %50 = vector.extract_strided_slice %49 {offsets = [0, 0], sizes = [8, 128], strides = [1, 1]} : vector<8x256xf32> to vector<8x128xf32>
    %c8 = arith.constant 8 : index
    %c0_23 = arith.constant 0 : index
    %51 = vector.load %arg7[%c8, %c0_23] : memref<64x128xf32, #tpu.memory_space<vmem>>, vector<8x128xf32>
    %52 = arith.addf %50, %51 : vector<8x128xf32>
    %53 = vector.broadcast %8 : vector<1x128xf32> to vector<8x128xf32>
    %54 = arith.mulf %52, %53 : vector<8x128xf32>
    %55 = math.tanh %54 : vector<8x128xf32>
    %cst_24 = arith.constant 5.000000e-01 : f32
    %56 = vector.broadcast %cst_24 : f32 to vector<8x128xf32>
    %57 = arith.mulf %56, %55 : vector<8x128xf32>
    %cst_25 = arith.constant 5.000000e-01 : f32
    %58 = vector.broadcast %cst_25 : f32 to vector<8x128xf32>
    %59 = arith.addf %58, %57 : vector<8x128xf32>
    %60 = vector.shape_cast %5 : vector<1x128xi1> to vector<1x128xi1>
    %61 = vector.broadcast %60 : vector<1x128xi1> to vector<8x128xi1>
    %62 = arith.select %61, %55, %59 : vector<8x128xi1>, vector<8x128xf32>
    %63 = vector.extract_strided_slice %62 {offsets = [0, 0], sizes = [8, 32], strides = [1, 1]} : vector<8x128xf32> to vector<8x32xf32>
    %64 = vector.extract_strided_slice %62 {offsets = [0, 32], sizes = [8, 32], strides = [1, 1]} : vector<8x128xf32> to vector<8x32xf32>
    %65 = vector.extract_strided_slice %62 {offsets = [0, 64], sizes = [8, 32], strides = [1, 1]} : vector<8x128xf32> to vector<8x32xf32>
    %66 = vector.extract_strided_slice %62 {offsets = [0, 96], sizes = [8, 32], strides = [1, 1]} : vector<8x128xf32> to vector<8x32xf32>
    %67 = arith.mulf %64, %42 : vector<8x32xf32>
    %68 = arith.mulf %63, %65 : vector<8x32xf32>
    %69 = arith.addf %67, %68 : vector<8x32xf32>
    %70 = math.tanh %69 : vector<8x32xf32>
    %71 = arith.mulf %66, %70 : vector<8x32xf32>
    %72 = vector.extract_strided_slice %49 {offsets = [0, 128], sizes = [8, 128], strides = [1, 1]} : vector<8x256xf32> to vector<8x128xf32>
    %73 = vector.broadcast %8 : vector<1x128xf32> to vector<8x128xf32>
    %74 = arith.mulf %72, %73 : vector<8x128xf32>
    %75 = math.tanh %74 : vector<8x128xf32>
    %cst_26 = arith.constant 5.000000e-01 : f32
    %76 = vector.broadcast %cst_26 : f32 to vector<8x128xf32>
    %77 = arith.mulf %76, %75 : vector<8x128xf32>
    %cst_27 = arith.constant 5.000000e-01 : f32
    %78 = vector.broadcast %cst_27 : f32 to vector<8x128xf32>
    %79 = arith.addf %78, %77 : vector<8x128xf32>
    %80 = vector.shape_cast %5 : vector<1x128xi1> to vector<1x128xi1>
    %81 = vector.broadcast %80 : vector<1x128xi1> to vector<8x128xi1>
    %82 = arith.select %81, %75, %79 : vector<8x128xi1>, vector<8x128xf32>
    %83 = vector.extract_strided_slice %82 {offsets = [0, 0], sizes = [8, 32], strides = [1, 1]} : vector<8x128xf32> to vector<8x32xf32>
    %84 = vector.extract_strided_slice %82 {offsets = [0, 32], sizes = [8, 32], strides = [1, 1]} : vector<8x128xf32> to vector<8x32xf32>
    %85 = vector.extract_strided_slice %82 {offsets = [0, 64], sizes = [8, 32], strides = [1, 1]} : vector<8x128xf32> to vector<8x32xf32>
    %86 = vector.extract_strided_slice %82 {offsets = [0, 96], sizes = [8, 32], strides = [1, 1]} : vector<8x128xf32> to vector<8x32xf32>
    %87 = arith.mulf %84, %17 : vector<8x32xf32>
    %88 = arith.mulf %83, %85 : vector<8x32xf32>
    %89 = arith.addf %87, %88 : vector<8x32xf32>
    %90 = math.tanh %89 : vector<8x32xf32>
    %91 = arith.mulf %86, %90 : vector<8x32xf32>
    %92 = tpu.concatenate %71, %91 in 1 : vector<8x32xf32>, vector<8x32xf32> -> vector<8x64xf32>
    %c0_28 = arith.constant 0 : index
    %c0_29 = arith.constant 0 : index
    %93 = vector.load %arg2[%c0_28, %c0_29] : memref<64x256xf32, #tpu.memory_space<vmem>>, vector<64x256xf32>
    %cst_30 = arith.constant dense<0.000000e+00> : vector<8x256xf32>
    %94 = tpu.matmul %92, %93, %cst_30 {dimension_numbers = #tpu.dot_dimension_numbers<[1], [0], [0], [1], [0, 0, 1, 1], [], []>} : vector<8x64xf32>, vector<64x256xf32>, vector<8x256xf32> -> vector<8x256xf32>
    %95 = vector.broadcast %13 : vector<1x256xf32> to vector<8x256xf32>
    %96 = arith.addf %94, %95 : vector<8x256xf32>
    %97 = vector.extract_strided_slice %96 {offsets = [0, 0], sizes = [8, 128], strides = [1, 1]} : vector<8x256xf32> to vector<8x128xf32>
    %c16 = arith.constant 16 : index
    %c0_31 = arith.constant 0 : index
    %98 = vector.load %arg7[%c16, %c0_31] : memref<64x128xf32, #tpu.memory_space<vmem>>, vector<8x128xf32>
    %99 = arith.addf %97, %98 : vector<8x128xf32>
    %100 = vector.broadcast %8 : vector<1x128xf32> to vector<8x128xf32>
    %101 = arith.mulf %99, %100 : vector<8x128xf32>
    %102 = math.tanh %101 : vector<8x128xf32>
    %cst_32 = arith.constant 5.000000e-01 : f32
    %103 = vector.broadcast %cst_32 : f32 to vector<8x128xf32>
    %104 = arith.mulf %103, %102 : vector<8x128xf32>
    %cst_33 = arith.constant 5.000000e-01 : f32
    %105 = vector.broadcast %cst_33 : f32 to vector<8x128xf32>
    %106 = arith.addf %105, %104 : vector<8x128xf32>
    %107 = vector.shape_cast %5 : vector<1x128xi1> to vector<1x128xi1>
    %108 = vector.broadcast %107 : vector<1x128xi1> to vector<8x128xi1>
    %109 = arith.select %108, %102, %106 : vector<8x128xi1>, vector<8x128xf32>
    %110 = vector.extract_strided_slice %109 {offsets = [0, 0], sizes = [8, 32], strides = [1, 1]} : vector<8x128xf32> to vector<8x32xf32>
    %111 = vector.extract_strided_slice %109 {offsets = [0, 32], sizes = [8, 32], strides = [1, 1]} : vector<8x128xf32> to vector<8x32xf32>
    %112 = vector.extract_strided_slice %109 {offsets = [0, 64], sizes = [8, 32], strides = [1, 1]} : vector<8x128xf32> to vector<8x32xf32>
    %113 = vector.extract_strided_slice %109 {offsets = [0, 96], sizes = [8, 32], strides = [1, 1]} : vector<8x128xf32> to vector<8x32xf32>
    %114 = arith.mulf %111, %69 : vector<8x32xf32>
    %115 = arith.mulf %110, %112 : vector<8x32xf32>
    %116 = arith.addf %114, %115 : vector<8x32xf32>
    %117 = math.tanh %116 : vector<8x32xf32>
    %118 = arith.mulf %113, %117 : vector<8x32xf32>
    %119 = vector.extract_strided_slice %96 {offsets = [0, 128], sizes = [8, 128], strides = [1, 1]} : vector<8x256xf32> to vector<8x128xf32>
    %120 = vector.broadcast %8 : vector<1x128xf32> to vector<8x128xf32>
    %121 = arith.mulf %119, %120 : vector<8x128xf32>
    %122 = math.tanh %121 : vector<8x128xf32>
    %cst_34 = arith.constant 5.000000e-01 : f32
    %123 = vector.broadcast %cst_34 : f32 to vector<8x128xf32>
    %124 = arith.mulf %123, %122 : vector<8x128xf32>
    %cst_35 = arith.constant 5.000000e-01 : f32
    %125 = vector.broadcast %cst_35 : f32 to vector<8x128xf32>
    %126 = arith.addf %125, %124 : vector<8x128xf32>
    %127 = vector.shape_cast %5 : vector<1x128xi1> to vector<1x128xi1>
    %128 = vector.broadcast %127 : vector<1x128xi1> to vector<8x128xi1>
    %129 = arith.select %128, %122, %126 : vector<8x128xi1>, vector<8x128xf32>
    %130 = vector.extract_strided_slice %129 {offsets = [0, 0], sizes = [8, 32], strides = [1, 1]} : vector<8x128xf32> to vector<8x32xf32>
    %131 = vector.extract_strided_slice %129 {offsets = [0, 32], sizes = [8, 32], strides = [1, 1]} : vector<8x128xf32> to vector<8x32xf32>
    %132 = vector.extract_strided_slice %129 {offsets = [0, 64], sizes = [8, 32], strides = [1, 1]} : vector<8x128xf32> to vector<8x32xf32>
    %133 = vector.extract_strided_slice %129 {offsets = [0, 96], sizes = [8, 32], strides = [1, 1]} : vector<8x128xf32> to vector<8x32xf32>
    %134 = arith.mulf %131, %89 : vector<8x32xf32>
    %135 = arith.mulf %130, %132 : vector<8x32xf32>
    %136 = arith.addf %134, %135 : vector<8x32xf32>
    %137 = math.tanh %136 : vector<8x32xf32>
    %138 = arith.mulf %133, %137 : vector<8x32xf32>
    %139 = tpu.concatenate %118, %138 in 1 : vector<8x32xf32>, vector<8x32xf32> -> vector<8x64xf32>
    %c0_36 = arith.constant 0 : index
    %c0_37 = arith.constant 0 : index
    %140 = vector.load %arg2[%c0_36, %c0_37] : memref<64x256xf32, #tpu.memory_space<vmem>>, vector<64x256xf32>
    %cst_38 = arith.constant dense<0.000000e+00> : vector<8x256xf32>
    %141 = tpu.matmul %139, %140, %cst_38 {dimension_numbers = #tpu.dot_dimension_numbers<[1], [0], [0], [1], [0, 0, 1, 1], [], []>} : vector<8x64xf32>, vector<64x256xf32>, vector<8x256xf32> -> vector<8x256xf32>
    %142 = vector.broadcast %13 : vector<1x256xf32> to vector<8x256xf32>
    %143 = arith.addf %141, %142 : vector<8x256xf32>
    %144 = vector.extract_strided_slice %143 {offsets = [0, 0], sizes = [8, 128], strides = [1, 1]} : vector<8x256xf32> to vector<8x128xf32>
    %c24 = arith.constant 24 : index
    %c0_39 = arith.constant 0 : index
    %145 = vector.load %arg7[%c24, %c0_39] : memref<64x128xf32, #tpu.memory_space<vmem>>, vector<8x128xf32>
    %146 = arith.addf %144, %145 : vector<8x128xf32>
    %147 = vector.broadcast %8 : vector<1x128xf32> to vector<8x128xf32>
    %148 = arith.mulf %146, %147 : vector<8x128xf32>
    %149 = math.tanh %148 : vector<8x128xf32>
    %cst_40 = arith.constant 5.000000e-01 : f32
    %150 = vector.broadcast %cst_40 : f32 to vector<8x128xf32>
    %151 = arith.mulf %150, %149 : vector<8x128xf32>
    %cst_41 = arith.constant 5.000000e-01 : f32
    %152 = vector.broadcast %cst_41 : f32 to vector<8x128xf32>
    %153 = arith.addf %152, %151 : vector<8x128xf32>
    %154 = vector.shape_cast %5 : vector<1x128xi1> to vector<1x128xi1>
    %155 = vector.broadcast %154 : vector<1x128xi1> to vector<8x128xi1>
    %156 = arith.select %155, %149, %153 : vector<8x128xi1>, vector<8x128xf32>
    %157 = vector.extract_strided_slice %156 {offsets = [0, 0], sizes = [8, 32], strides = [1, 1]} : vector<8x128xf32> to vector<8x32xf32>
    %158 = vector.extract_strided_slice %156 {offsets = [0, 32], sizes = [8, 32], strides = [1, 1]} : vector<8x128xf32> to vector<8x32xf32>
    %159 = vector.extract_strided_slice %156 {offsets = [0, 64], sizes = [8, 32], strides = [1, 1]} : vector<8x128xf32> to vector<8x32xf32>
    %160 = vector.extract_strided_slice %156 {offsets = [0, 96], sizes = [8, 32], strides = [1, 1]} : vector<8x128xf32> to vector<8x32xf32>
    %161 = arith.mulf %158, %116 : vector<8x32xf32>
    %162 = arith.mulf %157, %159 : vector<8x32xf32>
    %163 = arith.addf %161, %162 : vector<8x32xf32>
    %164 = math.tanh %163 : vector<8x32xf32>
    %165 = arith.mulf %160, %164 : vector<8x32xf32>
    %166 = vector.extract_strided_slice %143 {offsets = [0, 128], sizes = [8, 128], strides = [1, 1]} : vector<8x256xf32> to vector<8x128xf32>
    %167 = vector.broadcast %8 : vector<1x128xf32> to vector<8x128xf32>
    %168 = arith.mulf %166, %167 : vector<8x128xf32>
    %169 = math.tanh %168 : vector<8x128xf32>
    %cst_42 = arith.constant 5.000000e-01 : f32
    %170 = vector.broadcast %cst_42 : f32 to vector<8x128xf32>
    %171 = arith.mulf %170, %169 : vector<8x128xf32>
    %cst_43 = arith.constant 5.000000e-01 : f32
    %172 = vector.broadcast %cst_43 : f32 to vector<8x128xf32>
    %173 = arith.addf %172, %171 : vector<8x128xf32>
    %174 = vector.shape_cast %5 : vector<1x128xi1> to vector<1x128xi1>
    %175 = vector.broadcast %174 : vector<1x128xi1> to vector<8x128xi1>
    %176 = arith.select %175, %169, %173 : vector<8x128xi1>, vector<8x128xf32>
    %177 = vector.extract_strided_slice %176 {offsets = [0, 0], sizes = [8, 32], strides = [1, 1]} : vector<8x128xf32> to vector<8x32xf32>
    %178 = vector.extract_strided_slice %176 {offsets = [0, 32], sizes = [8, 32], strides = [1, 1]} : vector<8x128xf32> to vector<8x32xf32>
    %179 = vector.extract_strided_slice %176 {offsets = [0, 64], sizes = [8, 32], strides = [1, 1]} : vector<8x128xf32> to vector<8x32xf32>
    %180 = vector.extract_strided_slice %176 {offsets = [0, 96], sizes = [8, 32], strides = [1, 1]} : vector<8x128xf32> to vector<8x32xf32>
    %181 = arith.mulf %178, %136 : vector<8x32xf32>
    %182 = arith.mulf %177, %179 : vector<8x32xf32>
    %183 = arith.addf %181, %182 : vector<8x32xf32>
    %184 = math.tanh %183 : vector<8x32xf32>
    %185 = arith.mulf %180, %184 : vector<8x32xf32>
    %186 = tpu.concatenate %165, %185 in 1 : vector<8x32xf32>, vector<8x32xf32> -> vector<8x64xf32>
    %c0_44 = arith.constant 0 : index
    %c0_45 = arith.constant 0 : index
    %187 = vector.load %arg2[%c0_44, %c0_45] : memref<64x256xf32, #tpu.memory_space<vmem>>, vector<64x256xf32>
    %cst_46 = arith.constant dense<0.000000e+00> : vector<8x256xf32>
    %188 = tpu.matmul %186, %187, %cst_46 {dimension_numbers = #tpu.dot_dimension_numbers<[1], [0], [0], [1], [0, 0, 1, 1], [], []>} : vector<8x64xf32>, vector<64x256xf32>, vector<8x256xf32> -> vector<8x256xf32>
    %189 = vector.broadcast %13 : vector<1x256xf32> to vector<8x256xf32>
    %190 = arith.addf %188, %189 : vector<8x256xf32>
    %191 = vector.extract_strided_slice %190 {offsets = [0, 0], sizes = [8, 128], strides = [1, 1]} : vector<8x256xf32> to vector<8x128xf32>
    %c32 = arith.constant 32 : index
    %c0_47 = arith.constant 0 : index
    %192 = vector.load %arg7[%c32, %c0_47] : memref<64x128xf32, #tpu.memory_space<vmem>>, vector<8x128xf32>
    %193 = arith.addf %191, %192 : vector<8x128xf32>
    %194 = vector.broadcast %8 : vector<1x128xf32> to vector<8x128xf32>
    %195 = arith.mulf %193, %194 : vector<8x128xf32>
    %196 = math.tanh %195 : vector<8x128xf32>
    %cst_48 = arith.constant 5.000000e-01 : f32
    %197 = vector.broadcast %cst_48 : f32 to vector<8x128xf32>
    %198 = arith.mulf %197, %196 : vector<8x128xf32>
    %cst_49 = arith.constant 5.000000e-01 : f32
    %199 = vector.broadcast %cst_49 : f32 to vector<8x128xf32>
    %200 = arith.addf %199, %198 : vector<8x128xf32>
    %201 = vector.shape_cast %5 : vector<1x128xi1> to vector<1x128xi1>
    %202 = vector.broadcast %201 : vector<1x128xi1> to vector<8x128xi1>
    %203 = arith.select %202, %196, %200 : vector<8x128xi1>, vector<8x128xf32>
    %204 = vector.extract_strided_slice %203 {offsets = [0, 0], sizes = [8, 32], strides = [1, 1]} : vector<8x128xf32> to vector<8x32xf32>
    %205 = vector.extract_strided_slice %203 {offsets = [0, 32], sizes = [8, 32], strides = [1, 1]} : vector<8x128xf32> to vector<8x32xf32>
    %206 = vector.extract_strided_slice %203 {offsets = [0, 64], sizes = [8, 32], strides = [1, 1]} : vector<8x128xf32> to vector<8x32xf32>
    %207 = vector.extract_strided_slice %203 {offsets = [0, 96], sizes = [8, 32], strides = [1, 1]} : vector<8x128xf32> to vector<8x32xf32>
    %208 = arith.mulf %205, %163 : vector<8x32xf32>
    %209 = arith.mulf %204, %206 : vector<8x32xf32>
    %210 = arith.addf %208, %209 : vector<8x32xf32>
    %211 = math.tanh %210 : vector<8x32xf32>
    %212 = arith.mulf %207, %211 : vector<8x32xf32>
    %213 = vector.extract_strided_slice %190 {offsets = [0, 128], sizes = [8, 128], strides = [1, 1]} : vector<8x256xf32> to vector<8x128xf32>
    %214 = vector.broadcast %8 : vector<1x128xf32> to vector<8x128xf32>
    %215 = arith.mulf %213, %214 : vector<8x128xf32>
    %216 = math.tanh %215 : vector<8x128xf32>
    %cst_50 = arith.constant 5.000000e-01 : f32
    %217 = vector.broadcast %cst_50 : f32 to vector<8x128xf32>
    %218 = arith.mulf %217, %216 : vector<8x128xf32>
    %cst_51 = arith.constant 5.000000e-01 : f32
    %219 = vector.broadcast %cst_51 : f32 to vector<8x128xf32>
    %220 = arith.addf %219, %218 : vector<8x128xf32>
    %221 = vector.shape_cast %5 : vector<1x128xi1> to vector<1x128xi1>
    %222 = vector.broadcast %221 : vector<1x128xi1> to vector<8x128xi1>
    %223 = arith.select %222, %216, %220 : vector<8x128xi1>, vector<8x128xf32>
    %224 = vector.extract_strided_slice %223 {offsets = [0, 0], sizes = [8, 32], strides = [1, 1]} : vector<8x128xf32> to vector<8x32xf32>
    %225 = vector.extract_strided_slice %223 {offsets = [0, 32], sizes = [8, 32], strides = [1, 1]} : vector<8x128xf32> to vector<8x32xf32>
    %226 = vector.extract_strided_slice %223 {offsets = [0, 64], sizes = [8, 32], strides = [1, 1]} : vector<8x128xf32> to vector<8x32xf32>
    %227 = vector.extract_strided_slice %223 {offsets = [0, 96], sizes = [8, 32], strides = [1, 1]} : vector<8x128xf32> to vector<8x32xf32>
    %228 = arith.mulf %225, %183 : vector<8x32xf32>
    %229 = arith.mulf %224, %226 : vector<8x32xf32>
    %230 = arith.addf %228, %229 : vector<8x32xf32>
    %231 = math.tanh %230 : vector<8x32xf32>
    %232 = arith.mulf %227, %231 : vector<8x32xf32>
    %233 = tpu.concatenate %212, %232 in 1 : vector<8x32xf32>, vector<8x32xf32> -> vector<8x64xf32>
    %c0_52 = arith.constant 0 : index
    %c0_53 = arith.constant 0 : index
    %234 = vector.load %arg2[%c0_52, %c0_53] : memref<64x256xf32, #tpu.memory_space<vmem>>, vector<64x256xf32>
    %cst_54 = arith.constant dense<0.000000e+00> : vector<8x256xf32>
    %235 = tpu.matmul %233, %234, %cst_54 {dimension_numbers = #tpu.dot_dimension_numbers<[1], [0], [0], [1], [0, 0, 1, 1], [], []>} : vector<8x64xf32>, vector<64x256xf32>, vector<8x256xf32> -> vector<8x256xf32>
    %236 = vector.broadcast %13 : vector<1x256xf32> to vector<8x256xf32>
    %237 = arith.addf %235, %236 : vector<8x256xf32>
    %238 = vector.extract_strided_slice %237 {offsets = [0, 0], sizes = [8, 128], strides = [1, 1]} : vector<8x256xf32> to vector<8x128xf32>
    %c40 = arith.constant 40 : index
    %c0_55 = arith.constant 0 : index
    %239 = vector.load %arg7[%c40, %c0_55] : memref<64x128xf32, #tpu.memory_space<vmem>>, vector<8x128xf32>
    %240 = arith.addf %238, %239 : vector<8x128xf32>
    %241 = vector.broadcast %8 : vector<1x128xf32> to vector<8x128xf32>
    %242 = arith.mulf %240, %241 : vector<8x128xf32>
    %243 = math.tanh %242 : vector<8x128xf32>
    %cst_56 = arith.constant 5.000000e-01 : f32
    %244 = vector.broadcast %cst_56 : f32 to vector<8x128xf32>
    %245 = arith.mulf %244, %243 : vector<8x128xf32>
    %cst_57 = arith.constant 5.000000e-01 : f32
    %246 = vector.broadcast %cst_57 : f32 to vector<8x128xf32>
    %247 = arith.addf %246, %245 : vector<8x128xf32>
    %248 = vector.shape_cast %5 : vector<1x128xi1> to vector<1x128xi1>
    %249 = vector.broadcast %248 : vector<1x128xi1> to vector<8x128xi1>
    %250 = arith.select %249, %243, %247 : vector<8x128xi1>, vector<8x128xf32>
    %251 = vector.extract_strided_slice %250 {offsets = [0, 0], sizes = [8, 32], strides = [1, 1]} : vector<8x128xf32> to vector<8x32xf32>
    %252 = vector.extract_strided_slice %250 {offsets = [0, 32], sizes = [8, 32], strides = [1, 1]} : vector<8x128xf32> to vector<8x32xf32>
    %253 = vector.extract_strided_slice %250 {offsets = [0, 64], sizes = [8, 32], strides = [1, 1]} : vector<8x128xf32> to vector<8x32xf32>
    %254 = vector.extract_strided_slice %250 {offsets = [0, 96], sizes = [8, 32], strides = [1, 1]} : vector<8x128xf32> to vector<8x32xf32>
    %255 = arith.mulf %252, %210 : vector<8x32xf32>
    %256 = arith.mulf %251, %253 : vector<8x32xf32>
    %257 = arith.addf %255, %256 : vector<8x32xf32>
    %258 = math.tanh %257 : vector<8x32xf32>
    %259 = arith.mulf %254, %258 : vector<8x32xf32>
    %260 = vector.extract_strided_slice %237 {offsets = [0, 128], sizes = [8, 128], strides = [1, 1]} : vector<8x256xf32> to vector<8x128xf32>
    %261 = vector.broadcast %8 : vector<1x128xf32> to vector<8x128xf32>
    %262 = arith.mulf %260, %261 : vector<8x128xf32>
    %263 = math.tanh %262 : vector<8x128xf32>
    %cst_58 = arith.constant 5.000000e-01 : f32
    %264 = vector.broadcast %cst_58 : f32 to vector<8x128xf32>
    %265 = arith.mulf %264, %263 : vector<8x128xf32>
    %cst_59 = arith.constant 5.000000e-01 : f32
    %266 = vector.broadcast %cst_59 : f32 to vector<8x128xf32>
    %267 = arith.addf %266, %265 : vector<8x128xf32>
    %268 = vector.shape_cast %5 : vector<1x128xi1> to vector<1x128xi1>
    %269 = vector.broadcast %268 : vector<1x128xi1> to vector<8x128xi1>
    %270 = arith.select %269, %263, %267 : vector<8x128xi1>, vector<8x128xf32>
    %271 = vector.extract_strided_slice %270 {offsets = [0, 0], sizes = [8, 32], strides = [1, 1]} : vector<8x128xf32> to vector<8x32xf32>
    %272 = vector.extract_strided_slice %270 {offsets = [0, 32], sizes = [8, 32], strides = [1, 1]} : vector<8x128xf32> to vector<8x32xf32>
    %273 = vector.extract_strided_slice %270 {offsets = [0, 64], sizes = [8, 32], strides = [1, 1]} : vector<8x128xf32> to vector<8x32xf32>
    %274 = vector.extract_strided_slice %270 {offsets = [0, 96], sizes = [8, 32], strides = [1, 1]} : vector<8x128xf32> to vector<8x32xf32>
    %275 = arith.mulf %272, %230 : vector<8x32xf32>
    %276 = arith.mulf %271, %273 : vector<8x32xf32>
    %277 = arith.addf %275, %276 : vector<8x32xf32>
    %278 = math.tanh %277 : vector<8x32xf32>
    %279 = arith.mulf %274, %278 : vector<8x32xf32>
    %280 = tpu.concatenate %259, %279 in 1 : vector<8x32xf32>, vector<8x32xf32> -> vector<8x64xf32>
    %c0_60 = arith.constant 0 : index
    %c0_61 = arith.constant 0 : index
    %281 = vector.load %arg2[%c0_60, %c0_61] : memref<64x256xf32, #tpu.memory_space<vmem>>, vector<64x256xf32>
    %cst_62 = arith.constant dense<0.000000e+00> : vector<8x256xf32>
    %282 = tpu.matmul %280, %281, %cst_62 {dimension_numbers = #tpu.dot_dimension_numbers<[1], [0], [0], [1], [0, 0, 1, 1], [], []>} : vector<8x64xf32>, vector<64x256xf32>, vector<8x256xf32> -> vector<8x256xf32>
    %283 = vector.broadcast %13 : vector<1x256xf32> to vector<8x256xf32>
    %284 = arith.addf %282, %283 : vector<8x256xf32>
    %285 = vector.extract_strided_slice %284 {offsets = [0, 0], sizes = [8, 128], strides = [1, 1]} : vector<8x256xf32> to vector<8x128xf32>
    %c48 = arith.constant 48 : index
    %c0_63 = arith.constant 0 : index
    %286 = vector.load %arg7[%c48, %c0_63] : memref<64x128xf32, #tpu.memory_space<vmem>>, vector<8x128xf32>
    %287 = arith.addf %285, %286 : vector<8x128xf32>
    %288 = vector.broadcast %8 : vector<1x128xf32> to vector<8x128xf32>
    %289 = arith.mulf %287, %288 : vector<8x128xf32>
    %290 = math.tanh %289 : vector<8x128xf32>
    %cst_64 = arith.constant 5.000000e-01 : f32
    %291 = vector.broadcast %cst_64 : f32 to vector<8x128xf32>
    %292 = arith.mulf %291, %290 : vector<8x128xf32>
    %cst_65 = arith.constant 5.000000e-01 : f32
    %293 = vector.broadcast %cst_65 : f32 to vector<8x128xf32>
    %294 = arith.addf %293, %292 : vector<8x128xf32>
    %295 = vector.shape_cast %5 : vector<1x128xi1> to vector<1x128xi1>
    %296 = vector.broadcast %295 : vector<1x128xi1> to vector<8x128xi1>
    %297 = arith.select %296, %290, %294 : vector<8x128xi1>, vector<8x128xf32>
    %298 = vector.extract_strided_slice %297 {offsets = [0, 0], sizes = [8, 32], strides = [1, 1]} : vector<8x128xf32> to vector<8x32xf32>
    %299 = vector.extract_strided_slice %297 {offsets = [0, 32], sizes = [8, 32], strides = [1, 1]} : vector<8x128xf32> to vector<8x32xf32>
    %300 = vector.extract_strided_slice %297 {offsets = [0, 64], sizes = [8, 32], strides = [1, 1]} : vector<8x128xf32> to vector<8x32xf32>
    %301 = vector.extract_strided_slice %297 {offsets = [0, 96], sizes = [8, 32], strides = [1, 1]} : vector<8x128xf32> to vector<8x32xf32>
    %302 = arith.mulf %299, %257 : vector<8x32xf32>
    %303 = arith.mulf %298, %300 : vector<8x32xf32>
    %304 = arith.addf %302, %303 : vector<8x32xf32>
    %305 = math.tanh %304 : vector<8x32xf32>
    %306 = arith.mulf %301, %305 : vector<8x32xf32>
    %307 = vector.extract_strided_slice %284 {offsets = [0, 128], sizes = [8, 128], strides = [1, 1]} : vector<8x256xf32> to vector<8x128xf32>
    %308 = vector.broadcast %8 : vector<1x128xf32> to vector<8x128xf32>
    %309 = arith.mulf %307, %308 : vector<8x128xf32>
    %310 = math.tanh %309 : vector<8x128xf32>
    %cst_66 = arith.constant 5.000000e-01 : f32
    %311 = vector.broadcast %cst_66 : f32 to vector<8x128xf32>
    %312 = arith.mulf %311, %310 : vector<8x128xf32>
    %cst_67 = arith.constant 5.000000e-01 : f32
    %313 = vector.broadcast %cst_67 : f32 to vector<8x128xf32>
    %314 = arith.addf %313, %312 : vector<8x128xf32>
    %315 = vector.shape_cast %5 : vector<1x128xi1> to vector<1x128xi1>
    %316 = vector.broadcast %315 : vector<1x128xi1> to vector<8x128xi1>
    %317 = arith.select %316, %310, %314 : vector<8x128xi1>, vector<8x128xf32>
    %318 = vector.extract_strided_slice %317 {offsets = [0, 0], sizes = [8, 32], strides = [1, 1]} : vector<8x128xf32> to vector<8x32xf32>
    %319 = vector.extract_strided_slice %317 {offsets = [0, 32], sizes = [8, 32], strides = [1, 1]} : vector<8x128xf32> to vector<8x32xf32>
    %320 = vector.extract_strided_slice %317 {offsets = [0, 64], sizes = [8, 32], strides = [1, 1]} : vector<8x128xf32> to vector<8x32xf32>
    %321 = vector.extract_strided_slice %317 {offsets = [0, 96], sizes = [8, 32], strides = [1, 1]} : vector<8x128xf32> to vector<8x32xf32>
    %322 = arith.mulf %319, %277 : vector<8x32xf32>
    %323 = arith.mulf %318, %320 : vector<8x32xf32>
    %324 = arith.addf %322, %323 : vector<8x32xf32>
    %325 = math.tanh %324 : vector<8x32xf32>
    %326 = arith.mulf %321, %325 : vector<8x32xf32>
    %327 = tpu.concatenate %306, %326 in 1 : vector<8x32xf32>, vector<8x32xf32> -> vector<8x64xf32>
    %c0_68 = arith.constant 0 : index
    %c0_69 = arith.constant 0 : index
    %328 = vector.load %arg2[%c0_68, %c0_69] : memref<64x256xf32, #tpu.memory_space<vmem>>, vector<64x256xf32>
    %cst_70 = arith.constant dense<0.000000e+00> : vector<8x256xf32>
    %329 = tpu.matmul %327, %328, %cst_70 {dimension_numbers = #tpu.dot_dimension_numbers<[1], [0], [0], [1], [0, 0, 1, 1], [], []>} : vector<8x64xf32>, vector<64x256xf32>, vector<8x256xf32> -> vector<8x256xf32>
    %330 = vector.broadcast %13 : vector<1x256xf32> to vector<8x256xf32>
    %331 = arith.addf %329, %330 : vector<8x256xf32>
    %332 = vector.extract_strided_slice %331 {offsets = [0, 0], sizes = [8, 128], strides = [1, 1]} : vector<8x256xf32> to vector<8x128xf32>
    %c56 = arith.constant 56 : index
    %c0_71 = arith.constant 0 : index
    %333 = vector.load %arg7[%c56, %c0_71] : memref<64x128xf32, #tpu.memory_space<vmem>>, vector<8x128xf32>
    %334 = arith.addf %332, %333 : vector<8x128xf32>
    %335 = vector.broadcast %8 : vector<1x128xf32> to vector<8x128xf32>
    %336 = arith.mulf %334, %335 : vector<8x128xf32>
    %337 = math.tanh %336 : vector<8x128xf32>
    %cst_72 = arith.constant 5.000000e-01 : f32
    %338 = vector.broadcast %cst_72 : f32 to vector<8x128xf32>
    %339 = arith.mulf %338, %337 : vector<8x128xf32>
    %cst_73 = arith.constant 5.000000e-01 : f32
    %340 = vector.broadcast %cst_73 : f32 to vector<8x128xf32>
    %341 = arith.addf %340, %339 : vector<8x128xf32>
    %342 = vector.shape_cast %5 : vector<1x128xi1> to vector<1x128xi1>
    %343 = vector.broadcast %342 : vector<1x128xi1> to vector<8x128xi1>
    %344 = arith.select %343, %337, %341 : vector<8x128xi1>, vector<8x128xf32>
    %345 = vector.extract_strided_slice %344 {offsets = [0, 0], sizes = [8, 32], strides = [1, 1]} : vector<8x128xf32> to vector<8x32xf32>
    %346 = vector.extract_strided_slice %344 {offsets = [0, 32], sizes = [8, 32], strides = [1, 1]} : vector<8x128xf32> to vector<8x32xf32>
    %347 = vector.extract_strided_slice %344 {offsets = [0, 64], sizes = [8, 32], strides = [1, 1]} : vector<8x128xf32> to vector<8x32xf32>
    %348 = vector.extract_strided_slice %344 {offsets = [0, 96], sizes = [8, 32], strides = [1, 1]} : vector<8x128xf32> to vector<8x32xf32>
    %349 = arith.mulf %346, %304 : vector<8x32xf32>
    %350 = arith.mulf %345, %347 : vector<8x32xf32>
    %351 = arith.addf %349, %350 : vector<8x32xf32>
    %352 = math.tanh %351 : vector<8x32xf32>
    %353 = arith.mulf %348, %352 : vector<8x32xf32>
    %354 = vector.extract_strided_slice %331 {offsets = [0, 128], sizes = [8, 128], strides = [1, 1]} : vector<8x256xf32> to vector<8x128xf32>
    %355 = vector.broadcast %8 : vector<1x128xf32> to vector<8x128xf32>
    %356 = arith.mulf %354, %355 : vector<8x128xf32>
    %357 = math.tanh %356 : vector<8x128xf32>
    %cst_74 = arith.constant 5.000000e-01 : f32
    %358 = vector.broadcast %cst_74 : f32 to vector<8x128xf32>
    %359 = arith.mulf %358, %357 : vector<8x128xf32>
    %cst_75 = arith.constant 5.000000e-01 : f32
    %360 = vector.broadcast %cst_75 : f32 to vector<8x128xf32>
    %361 = arith.addf %360, %359 : vector<8x128xf32>
    %362 = vector.shape_cast %5 : vector<1x128xi1> to vector<1x128xi1>
    %363 = vector.broadcast %362 : vector<1x128xi1> to vector<8x128xi1>
    %364 = arith.select %363, %357, %361 : vector<8x128xi1>, vector<8x128xf32>
    %365 = vector.extract_strided_slice %364 {offsets = [0, 0], sizes = [8, 32], strides = [1, 1]} : vector<8x128xf32> to vector<8x32xf32>
    %366 = vector.extract_strided_slice %364 {offsets = [0, 32], sizes = [8, 32], strides = [1, 1]} : vector<8x128xf32> to vector<8x32xf32>
    %367 = vector.extract_strided_slice %364 {offsets = [0, 64], sizes = [8, 32], strides = [1, 1]} : vector<8x128xf32> to vector<8x32xf32>
    %368 = vector.extract_strided_slice %364 {offsets = [0, 96], sizes = [8, 32], strides = [1, 1]} : vector<8x128xf32> to vector<8x32xf32>
    %369 = arith.mulf %366, %324 : vector<8x32xf32>
    %370 = arith.mulf %365, %367 : vector<8x32xf32>
    %371 = arith.addf %369, %370 : vector<8x32xf32>
    %372 = math.tanh %371 : vector<8x32xf32>
    %373 = arith.mulf %368, %372 : vector<8x32xf32>
    %374 = tpu.concatenate %353, %373 in 1 : vector<8x32xf32>, vector<8x32xf32> -> vector<8x64xf32>
    %c0_76 = arith.constant 0 : index
    %c0_77 = arith.constant 0 : index
    %375 = vector.load %arg2[%c0_76, %c0_77] : memref<64x256xf32, #tpu.memory_space<vmem>>, vector<64x256xf32>
    %cst_78 = arith.constant dense<0.000000e+00> : vector<8x256xf32>
    %376 = tpu.matmul %374, %375, %cst_78 {dimension_numbers = #tpu.dot_dimension_numbers<[1], [0], [0], [1], [0, 0, 1, 1], [], []>} : vector<8x64xf32>, vector<64x256xf32>, vector<8x256xf32> -> vector<8x256xf32>
    %377 = vector.broadcast %13 : vector<1x256xf32> to vector<8x256xf32>
    %378 = arith.addf %376, %377 : vector<8x256xf32>
    %379 = vector.extract_strided_slice %378 {offsets = [0, 128], sizes = [8, 128], strides = [1, 1]} : vector<8x256xf32> to vector<8x128xf32>
    %380 = vector.broadcast %8 : vector<1x128xf32> to vector<8x128xf32>
    %381 = arith.mulf %379, %380 : vector<8x128xf32>
    %382 = math.tanh %381 : vector<8x128xf32>
    %cst_79 = arith.constant 5.000000e-01 : f32
    %383 = vector.broadcast %cst_79 : f32 to vector<8x128xf32>
    %384 = arith.mulf %383, %382 : vector<8x128xf32>
    %cst_80 = arith.constant 5.000000e-01 : f32
    %385 = vector.broadcast %cst_80 : f32 to vector<8x128xf32>
    %386 = arith.addf %385, %384 : vector<8x128xf32>
    %387 = vector.shape_cast %5 : vector<1x128xi1> to vector<1x128xi1>
    %388 = vector.broadcast %387 : vector<1x128xi1> to vector<8x128xi1>
    %389 = arith.select %388, %382, %386 : vector<8x128xi1>, vector<8x128xf32>
    %390 = vector.extract_strided_slice %389 {offsets = [0, 0], sizes = [8, 32], strides = [1, 1]} : vector<8x128xf32> to vector<8x32xf32>
    %391 = vector.extract_strided_slice %389 {offsets = [0, 32], sizes = [8, 32], strides = [1, 1]} : vector<8x128xf32> to vector<8x32xf32>
    %392 = vector.extract_strided_slice %389 {offsets = [0, 64], sizes = [8, 32], strides = [1, 1]} : vector<8x128xf32> to vector<8x32xf32>
    %393 = vector.extract_strided_slice %389 {offsets = [0, 96], sizes = [8, 32], strides = [1, 1]} : vector<8x128xf32> to vector<8x32xf32>
    %394 = arith.mulf %391, %371 : vector<8x32xf32>
    %395 = arith.mulf %390, %392 : vector<8x32xf32>
    %396 = arith.addf %394, %395 : vector<8x32xf32>
    %397 = math.tanh %396 : vector<8x32xf32>
    %398 = arith.mulf %393, %397 : vector<8x32xf32>
    %c0_81 = arith.constant 0 : index
    %c0_82 = arith.constant 0 : index
    %399 = vector.load %arg4[%c0_81, %c0_82] : memref<32x8xf32, #tpu.memory_space<vmem>>, vector<32x8xf32>
    %cst_83 = arith.constant dense<0.000000e+00> : vector<8x8xf32>
    %400 = tpu.matmul %398, %399, %cst_83 {dimension_numbers = #tpu.dot_dimension_numbers<[1], [0], [0], [1], [0, 0, 1, 1], [], []>} : vector<8x32xf32>, vector<32x8xf32>, vector<8x8xf32> -> vector<8x8xf32>
    %c0_84 = arith.constant 0 : index
    %c0_85 = arith.constant 0 : index
    %401 = vector.load %arg5[%c0_84, %c0_85] : memref<1x8xf32, #tpu.memory_space<vmem>>, vector<1x8xf32>
    %402 = vector.broadcast %401 : vector<1x8xf32> to vector<8x8xf32>
    %403 = arith.addf %400, %402 : vector<8x8xf32>
    %c0_86 = arith.constant 0 : index
    %c0_87 = arith.constant 0 : index
    %404 = vector.load %arg6[%c0_86, %c0_87] : memref<8x8xf32, #tpu.memory_space<vmem>>, vector<8x8xf32>
    tpu.vector_store %arg6[%c0_86, %c0_87], %403 {strides = array<i32>} : memref<8x8xf32, #tpu.memory_space<vmem>>, vector<8x8xf32>,
    return
  }
}

</mosaic_0001>

<bundles_post_ra>
// kernel: lstm_model_forward.1
= control target key start
LH: loop header
LB: loop body
LE: loop exit
PB: predicated region body
PF: predicated region fallthrough
CT: control target
= control target key end

     0   :  { %v1530_v3 = vmov 0.0   ;;  %vm39_vm0 = vcmask 130048   ;;  %v23_v21 = vlaneseq  ;;  %v1531_v32 = vmov 0.5   ;;  %s1533_s13 = smov 32   ;;  %s2058_s2 = inlined_call_operand.vmem [shape: f32[64,256], index: 2, kind: input, shape index: {}]   ;;  %s2059_s1 = inlined_call_operand.vmem [shape: f32[16,128], index: 1, kind: input, shape index: {}]   ;;  %s2060_s0 = inlined_call_operand.vmem [shape: f32[64,16], index: 0, kind: input, shape index: {}]   ;;  %s2061_s3 = inlined_call_operand.vmem [shape: f32[1,256], index: 3, kind: input, shape index: {}]   ;;  %s2062_s4 = inlined_call_operand.vmem [shape: f32[32,8], index: 4, kind: input, shape index: {}]   ;;  %s2063_s5 = inlined_call_operand.vmem [shape: f32[1,8], index: 5, kind: input, shape index: {}]   ;;  %s2064_s6 = inlined_call_operand.vmem [shape: f32[8,8], index: 6, kind: output, shape index: {}]  }
   0x1   :  { %v1573_v0 = vld [vmem:[%s2058_s2 + $0x78] sm:$0xff]  ;;  %v1578_v1 = vld [vmem:[%s2058_s2 + $0x70] sm:$0xff]  ;;  %v1583_v2 = vld [vmem:[%s2058_s2 + $0x68] sm:$0xff]  ;;  %273 = vmatprep.mubr.f32.mxu1 %v1530_v3  ;;  %vm309_vm4 = vcmask 261120   ;;  %vm205_vm5 = vcmask 523264   ;;  %vm1534_vm6 = vmmov 0  }
   0x2   :  { %225 = vmatprep.subr.mxu1 %v1573_v0  ;;  %v1590_v4 = vld [vmem:[%s2058_s2 + $0x60] sm:$0xff]  ;;  %v1596_v5 = vld [vmem:[%s2058_s2 + $0x58] sm:$0xff]  ;;  %v1602_v6 = vld [vmem:[%s2058_s2 + $0x50] sm:$0xff]  ;;  %v1717_v22 = vshrl.u32 %v23_v21, 7  ;;  %v24_v23 = vand.u32 127, %v23_v21  ;;  %vm1395_vm7 = vcmask 64512  }
   0x3   :  { %226 = vmatpush1.msra.mxu1 %v1578_v1  ;;  %v38_v7 = vld [vmem:[%s2059_s1 + $0x8] sm:$0xff]  ;;  %v37_v9 = vld [vmem:[%s2059_s1] sm:$0xff]  ;;  %v1629_v12 = vld [vmem:[%s2058_s2 + $0x38] sm:$0xff] }
   0x4   :  { %227 = vmatprep.subr.mxu1 %v1583_v2  ;;  %v1611_v8 = vld [vmem:[%s2058_s2 + $0x48] sm:$0xff]  ;;  %1434 = vmatprep.subr.mxu0 %v38_v7  ;;  %v1620_v10 = vld [vmem:[%s2058_s2 + $0x40] sm:$0xff]  ;;  %v1638_v14 = vld [vmem:[%s2058_s2 + $0x30] sm:$0xff]  ;;  %v197_v24 = vsub.s32 0, %v1717_v22  ;;  %vm25_vm1 = vcmp.ge.s32.totalorder %v24_v23, 64  ;;  %vm26_vm2 = vcmp.lt.s32.totalorder %v24_v23, 96 }
   0x5   :  { %228 = vmatpush1.msra.mxu1 %v1590_v4  ;;  %1435 = vmatpush3.msra.mxu0 %v38_v7  ;;  %v29_v11 = vld [vmem:[%s2060_s0] sm:$0xff]  ;;  %v30_v13 = vld [vmem:[%s2060_s0 + $0x8] sm:$0xff]  ;;  %v1658_v17 = vld [vmem:[%s2058_s2 + $0x18] sm:$0xff]  ;;  %v201_v62 = vsub.s32 1, %v1717_v22 }
   0x6   :  { %229 = vmatprep.subr.mxu1 %v1596_v5  ;;  %1436 = vmatprep.subr.mxu0 %v37_v9  ;;  %v1644_v15 = vld [vmem:[%s2058_s2 + $0x28] sm:$0xff]  ;;  %v1651_v16 = vld [vmem:[%s2058_s2 + $0x20] sm:$0xff]  ;;  %v1665_v18 = vld [vmem:[%s2058_s2 + $0x10] sm:$0xff] }
   0x7   :  { %230 = vmatpush1.msra.mxu1 %v1602_v6  ;;  %1437 = vmatpush3.msra.mxu0 %v37_v9  ;;  %v1672_v19 = vld [vmem:[%s2058_s2 + $0x8] sm:$0xff]  ;;  %v1679_v20 = vld [vmem:[%s2058_s2] sm:$0xff]  ;;  %vm1730_vm3 = vmand %vm25_vm1, %vm26_vm2 }
   0x8   :  { %231 = vmatprep.subr.mxu1 %v1611_v8  ;;  %1438 = vmatprep.mubr.msk.f32.mxu0 %vm39_vm0, %v29_v11  ;;  %v1723_v25 = vld [vmem:[%s2061_s3] sm:$0x3]  ;;  %v1737_v33 = vsel %vm1730_vm3, 1.0, %v1531_v32  ;;  %s1532_s3 = smov 64   ;;  %v31_v46 = vld [vmem:[%s2060_s0 + $0x10] sm:$0xff]  ;;  %v32_v47 = vld [vmem:[%s2060_s0 + $0x18] sm:$0xff] }
   0x9   :  { %232 = vmatpush1.msra.mxu1 %v1620_v10  ;;  %1439 = vmatmul.mubr.msk.f32.vlgmr.msra.gmra.mxu0 %vm39_vm0, %v30_v13  ;;  %v1726_v26 = vrot.slane %v1723_v25, %v197_v24  ;;  %v33_v48 = vld [vmem:[%s2060_s0 + $0x20] sm:$0xff]  ;;  %v34_v49 = vld [vmem:[%s2060_s0 + $0x28] sm:$0xff]  ;;  %v35_v50 = vld [vmem:[%s2060_s0 + $0x30] sm:$0xff]  ;;  %v1807_v7 = vrot.slane %v1723_v25, %v201_v62 }
   0xa   :  { %233 = vmatprep.subr.mxu1 %v1629_v12  ;;  %330 = vmatprep.subr.mxu0 %v1573_v0  ;;  %v36_v51 = vld [vmem:[%s2060_s0 + $0x38] sm:$0xff]  ;;  %v1310_v28 = vld [vmem:[%s2062_s4 + $0x8] sm:$0xff] }
   0xb   :  { %234 = vmatpush1.msra.mxu1 %v1638_v14  ;;  %331 = vmatpush1.msra.mxu0 %v1578_v1 }
   0xc   :  { %235 = vmatprep.subr.mxu1 %v1644_v15  ;;  %332 = vmatprep.subr.mxu0 %v1583_v2 }
   0xd   :  { %236 = vmatpush1.msra.mxu1 %v1651_v16  ;;  %333 = vmatpush1.msra.mxu0 %v1590_v4 }
   0xe   :  { %237 = vmatprep.subr.mxu1 %v1658_v17  ;;  %334 = vmatprep.subr.mxu0 %v1596_v5 }
   0xf   :  { %238 = vmatpush1.msra.mxu1 %v1665_v18  ;;  %335 = vmatpush1.msra.mxu0 %v1602_v6 }
  0x10   :  { %239 = vmatprep.subr.mxu1 %v1672_v19  ;;  %336 = vmatprep.subr.mxu0 %v1611_v8 }
  0x11   :  { %240 = vmatpush1.msra.mxu1 %v1679_v20  ;;  %337 = vmatpush1.msra.mxu0 %v1620_v10 }
  0x12   :  { %274 = vmatmul.mubr.f32.vlgmr.msra.gmra.mxu1 %v1530_v3  ;;  %338 = vmatprep.subr.mxu0 %v1629_v12 }
  0x13   :  { %459 = vmatprep.subr.mxu1 %v1573_v0  ;;  %339 = vmatpush1.msra.mxu0 %v1638_v14 }
  0x14   :  { %460 = vmatpush1.msra.mxu1 %v1578_v1  ;;  %340 = vmatprep.subr.mxu0 %v1644_v15 }
  0x15   :  { %461 = vmatprep.subr.mxu1 %v1583_v2  ;;  %341 = vmatpush1.msra.mxu0 %v1651_v16 }
  0x16   :  { %462 = vmatpush1.msra.mxu1 %v1590_v4  ;;  %342 = vmatprep.subr.mxu0 %v1658_v17 }
  0x17   :  { %463 = vmatprep.subr.mxu1 %v1596_v5  ;;  %343 = vmatpush1.msra.mxu0 %v1665_v18 }
  0x18   :  { %464 = vmatpush1.msra.mxu1 %v1602_v6  ;;  %344 = vmatprep.subr.mxu0 %v1672_v19 }
  0x19   :  { %465 = vmatprep.subr.mxu1 %v1611_v8  ;;  %345 = vmatpush1.msra.mxu0 %v1679_v20 }
  0x1a   :  { %466 = vmatpush1.msra.mxu1 %v1620_v10  ;;  %507 = vmatprep.mubr.f32.mxu1 %v1530_v3 }
  0x1b   :  { %467 = vmatprep.subr.mxu1 %v1629_v12  ;;  %588 = vmatprep.subr.mxu0 %v1573_v0 }
  0x1c   :  { %468 = vmatpush1.msra.mxu1 %v1638_v14  ;;  %1441 = vmatprep.mubr.msk.f32.mxu0 %vm39_vm0, %v31_v46 }
  0x1d   :  { %469 = vmatprep.subr.mxu1 %v1644_v15  ;;  %1442 = vmatmul.mubr.msk.f32.gmra.mxu0 %vm39_vm0, %v32_v47 }
  0x1e   :  { %470 = vmatpush1.msra.mxu1 %v1651_v16  ;;  %1444 = vmatprep.mubr.msk.f32.mxu0 %vm39_vm0, %v33_v48 }
  0x1f   :  { %471 = vmatprep.subr.mxu1 %v1658_v17 }
  0x20   :  { %472 = vmatpush1.msra.mxu1 %v1665_v18 }
  0x21   :  { %473 = vmatprep.subr.mxu1 %v1672_v19  ;;  %1445 = vmatmul.mubr.msk.f32.gmra.mxu0 %vm39_vm0, %v34_v49 }
  0x22   :  { %474 = vmatpush1.msra.mxu1 %v1679_v20  ;;  %1447 = vmatprep.mubr.msk.f32.mxu0 %vm39_vm0, %v35_v50 }
  0x23   :  { %717 = vmatprep.subr.mxu1 %v1573_v0 }
  0x25   :  { %1448 = vmatmul.mubr.msk.f32.gmra.mxu0 %vm39_vm0, %v36_v51 }
  0x26   :  { %378 = vmatprep.mubr.f32.mxu0 %v1530_v3 }
  0xc9   :  { %v1728_v27 = vpop.f32.mrf.mxu0 }
  0xcb   :  { %v130_v31 = vpop.f32.mrf.mxu0 }
  0xd2   :  { %v275_v29 = vpop.f32.mrf.mxu1 }
  0xd3   :  { %v276_v30 = vadd.f32 %v275_v29, %v1726_v26 }
  0xd4   :  { %v277_v34 = vpop.f32.mrf.mxu1 }
  0xd5   :  { %v280_v35 = vadd.f32 %v276_v30, %v130_v31 }
  0xd7   :  { %v281_v36 = vmul.f32 %v280_v35, %v1737_v33 }
  0xd9   :  { %1466 = vtanh.f32 %v281_v36 }
  0xdd   :  { %v1793_v57 = vpop.f32.mrf.mxu0 }
  0xdf   :  { %v1795_v58 = vpop.f32.mrf.mxu0 }
  0xe1   :  { %v1797_v59 = vpop.f32.mrf.mxu0 }
  0xe3   :  { %v1799_v60 = vpop.f32.mrf.mxu0 }
  0xe5   :  { %v1801_v61 = vpop.f32.mrf.mxu0 }
  0xe6   :  { %v1467_v37 = vpop.eup %1466 }
  0xe7   :  { %v283_v38 = vmul.f32 0.5, %v1467_v37  ;;  %v1804_v63 = vpop.f32.mrf.mxu0 }
  0xe9   :  { %v284_v39 = vadd.f32 0.5, %v283_v38 }
  0xeb   :  { %v287_v40 = vsel %vm1730_vm3, %v1467_v37, %v284_v39 }
  0xec   :  { %290 = vrot.lane.b32.xlu0 %v287_v40, %s1532_s3  ;;  %v288_v43 = vmul.f32 0.0, %v287_v40 }
 0x15e   :  { %v291_v41 = vpop.permute.xlu0 %290 }
 0x15f   :  { %v293_v42 = vmul.f32 %v291_v41, %v287_v40 }
 0x161   :  { %295 = vrot.lane.b32.xlu0 %v293_v42, %s1533_s13 }
 0x1d3   :  { %v296_v44 = vpop.permute.xlu0 %295 }
 0x1d4   :  { %v1744_v45 = vadd.f32 %v296_v44, %v288_v43 }
 0x1d6   :  { %1468 = vtanh.f32 %v1744_v45 }
 0x1e3   :  { %v1469_v52 = vpop.eup %1468 }
 0x1e4   :  { %301 = vrot.lane.b32.xlu1 %v1469_v52, %s1532_s3 }
 0x256   :  { %v302_v53 = vpop.permute.xlu1 %301 }
 0x257   :  { %v304_v54 = vmul.f32 %v302_v53, %v287_v40 }
 0x259   :  { %306 = vrot.lane.b32.xlu1 %v304_v54, %s1533_s13 }
 0x2cb   :  { %v307_v55 = vpop.permute.xlu1 %306 }
 0x2cc   :  { %v310_v56 = vsel %vm309_vm4, %v307_v55, 0.0 }
 0x2cd   :  { %1409 = vmatmul.mubr.msk.f32.vlgmr.msra.gmra.mxu0 %vm205_vm5, %v310_v56 }
 0x2ce   :  { %589 = vmatpush1.msra.mxu0 %v1578_v1  ;;  %636 = vmatprep.mubr.f32.mxu0 %v1530_v3 }
 0x2cf   :  { %590 = vmatprep.subr.mxu0 %v1583_v2 }
 0x2d0   :  { %591 = vmatpush1.msra.mxu0 %v1590_v4 }
 0x2d1   :  { %592 = vmatprep.subr.mxu0 %v1596_v5 }
 0x2d2   :  { %593 = vmatpush1.msra.mxu0 %v1602_v6 }
 0x2d3   :  { %594 = vmatprep.subr.mxu0 %v1611_v8 }
 0x2d4   :  { %595 = vmatpush1.msra.mxu0 %v1620_v10 }
 0x2d5   :  { %596 = vmatprep.subr.mxu0 %v1629_v12 }
 0x2d6   :  { %597 = vmatpush1.msra.mxu0 %v1638_v14 }
 0x2d7   :  { %598 = vmatprep.subr.mxu0 %v1644_v15 }
 0x2d8   :  { %599 = vmatpush1.msra.mxu0 %v1651_v16 }
 0x2d9   :  { %600 = vmatprep.subr.mxu0 %v1658_v17 }
 0x2da   :  { %601 = vmatpush1.msra.mxu0 %v1665_v18 }
 0x2db   :  { %602 = vmatprep.subr.mxu0 %v1672_v19 }
 0x2dc   :  { %603 = vmatpush1.msra.mxu0 %v1679_v20 }
 0x2dd   :  { %846 = vmatprep.subr.mxu0 %v1573_v0 }
 0x38d   :  { %v380_v9 = vpop.f32.mrf.mxu0 }
 0x38e   :  { %v381_v11 = vadd.f32 %v380_v9, %v1726_v26 }
 0x38f   :  { %v382_v13 = vpop.f32.mrf.mxu0 }
 0x390   :  { %v386_v21 = vadd.f32 %v1728_v27, %v381_v11  ;;  %v383_v23 = vadd.f32 %v382_v13, %v1807_v7 }
 0x392   :  { %v387_v24 = vmul.f32 %v386_v21, %v1737_v33  ;;  %v409_v29 = vmul.f32 %v383_v23, %v1737_v33 }
 0x394   :  { %1470 = vtanh.f32 %v387_v24 }
 0x395   :  { %1472 = vtanh.f32 %v409_v29 }
 0x3a1   :  { %v1471_v22 = vpop.eup %1470 }
 0x3a2   :  { %v1473_v30 = vpop.eup %1472  ;;  %v389_v31 = vmul.f32 0.5, %v1471_v22 }
 0x3a3   :  { %v411_v32 = vmul.f32 0.5, %v1473_v30 }
 0x3a4   :  { %v390_v25 = vadd.f32 0.5, %v389_v31 }
 0x3a5   :  { %v412_v34 = vadd.f32 0.5, %v411_v32 }
 0x3a6   :  { %v391_v35 = vsel %vm1730_vm3, %v1471_v22, %v390_v25 }
 0x3a7   :  { %v413_v27 = vsel %vm1730_vm3, %v1473_v30, %v412_v34  ;;  %394 = vrot.lane.b32.xlu0 %v391_v35, %s1532_s3  ;;  %v392_v40 = vmul.f32 %v391_v35, %v1744_v45 }
 0x3a8   :  { %416 = vrot.lane.b32.xlu1 %v413_v27, %s1532_s3  ;;  %v414_v41 = vmul.f32 0.0, %v413_v27 }
 0x419   :  { %v395_v36 = vpop.permute.xlu0 %394 }
 0x41a   :  { %v417_v37 = vpop.permute.xlu1 %416  ;;  %v397_v38 = vmul.f32 %v395_v36, %v391_v35 }
 0x41b   :  { %v419_v39 = vmul.f32 %v417_v37, %v413_v27 }
 0x41c   :  { %399 = vrot.lane.b32.xlu0 %v397_v38, %s1533_s13 }
 0x41d   :  { %421 = vrot.lane.b32.xlu1 %v419_v39, %s1533_s13 }
 0x48e   :  { %v400_v42 = vpop.permute.xlu0 %399 }
 0x48f   :  { %v422_v43 = vpop.permute.xlu1 %421  ;;  %v402_v44 = vadd.f32 %v400_v42, %v392_v40 }
 0x490   :  { %v424_v46 = vadd.f32 %v422_v43, %v414_v41 }
 0x491   :  { %1474 = vtanh.f32 %v402_v44 }
 0x492   :  { %1476 = vtanh.f32 %v424_v46 }
 0x49e   :  { %v1475_v47 = vpop.eup %1474 }
 0x49f   :  { %v1477_v48 = vpop.eup %1476  ;;  %405 = vrot.lane.b32.xlu0 %v1475_v47, %s1532_s3 }
 0x4a0   :  { %427 = vrot.lane.b32.xlu1 %v1477_v48, %s1532_s3 }
 0x511   :  { %v406_v49 = vpop.permute.xlu0 %405 }
 0x512   :  { %v428_v50 = vpop.permute.xlu1 %427  ;;  %v408_v51 = vmul.f32 %v406_v49, %v391_v35 }
 0x513   :  { %v430_v52 = vmul.f32 %v428_v50, %v413_v27 }
 0x514   :  { %432 = vrot.lane.b32.xlu0 %v408_v51, %s1533_s13 }
 0x515   :  { %436 = vrot.lane.b32.xlu1 %v430_v52, %s1532_s3 }
 0x586   :  { %v433_v45 = vpop.permute.xlu0 %432 }
 0x587   :  { %v437_v53 = vpop.permute.xlu1 %436 }
 0x588   :  { %v439_v54 = vsel %vm309_vm4, %v433_v45, %v437_v53 }
 0x589   :  { %1410 = vmatmul.mubr.msk.f32.vlgmr.msra.gmra.mxu1 %vm205_vm5, %v439_v54 }
 0x58a   :  { %718 = vmatpush1.msra.mxu1 %v1578_v1  ;;  %765 = vmatprep.mubr.f32.mxu1 %v1530_v3 }
 0x58b   :  { %719 = vmatprep.subr.mxu1 %v1583_v2 }
 0x58c   :  { %720 = vmatpush1.msra.mxu1 %v1590_v4 }
 0x58d   :  { %721 = vmatprep.subr.mxu1 %v1596_v5 }
 0x58e   :  { %722 = vmatpush1.msra.mxu1 %v1602_v6 }
 0x58f   :  { %723 = vmatprep.subr.mxu1 %v1611_v8 }
 0x590   :  { %724 = vmatpush1.msra.mxu1 %v1620_v10 }
 0x591   :  { %725 = vmatprep.subr.mxu1 %v1629_v12 }
 0x592   :  { %726 = vmatpush1.msra.mxu1 %v1638_v14 }
 0x593   :  { %727 = vmatprep.subr.mxu1 %v1644_v15 }
 0x594   :  { %728 = vmatpush1.msra.mxu1 %v1651_v16 }
 0x595   :  { %729 = vmatprep.subr.mxu1 %v1658_v17 }
 0x596   :  { %730 = vmatpush1.msra.mxu1 %v1665_v18 }
 0x597   :  { %731 = vmatprep.subr.mxu1 %v1672_v19 }
 0x598   :  { %732 = vmatpush1.msra.mxu1 %v1679_v20 }
 0x599   :  { %975 = vmatprep.subr.mxu1 %v1573_v0 }
 0x649   :  { %v509_v55 = vpop.f32.mrf.mxu1 }
 0x64a   :  { %v510_v56 = vadd.f32 %v509_v55, %v1726_v26 }
 0x64b   :  { %v511_v62 = vpop.f32.mrf.mxu1 }
 0x64c   :  { %v515_v9 = vadd.f32 %v510_v56, %v1795_v58  ;;  %v512_v11 = vadd.f32 %v511_v62, %v1807_v7 }
 0x64e   :  { %v516_v13 = vmul.f32 %v515_v9, %v1737_v33  ;;  %v538_v21 = vmul.f32 %v512_v11, %v1737_v33 }
 0x650   :  { %1478 = vtanh.f32 %v516_v13 }
 0x651   :  { %1480 = vtanh.f32 %v538_v21 }
 0x65d   :  { %v1479_v23 = vpop.eup %1478 }
 0x65e   :  { %v1481_v24 = vpop.eup %1480  ;;  %v518_v29 = vmul.f32 0.5, %v1479_v23 }
 0x65f   :  { %v540_v22 = vmul.f32 0.5, %v1481_v24 }
 0x660   :  { %v519_v30 = vadd.f32 0.5, %v518_v29 }
 0x661   :  { %v541_v31 = vadd.f32 0.5, %v540_v22 }
 0x662   :  { %v520_v32 = vsel %vm1730_vm3, %v1479_v23, %v519_v30 }
 0x663   :  { %v542_v58 = vsel %vm1730_vm3, %v1481_v24, %v541_v31  ;;  %523 = vrot.lane.b32.xlu0 %v520_v32, %s1532_s3  ;;  %v521_v36 = vmul.f32 %v520_v32, %v402_v44 }
 0x664   :  { %545 = vrot.lane.b32.xlu1 %v542_v58, %s1532_s3  ;;  %v543_v37 = vmul.f32 %v542_v58, %v424_v46 }
 0x6d5   :  { %v524_v25 = vpop.permute.xlu0 %523 }
 0x6d6   :  { %v546_v34 = vpop.permute.xlu1 %545  ;;  %v526_v35 = vmul.f32 %v524_v25, %v520_v32 }
 0x6d7   :  { %v548_v27 = vmul.f32 %v546_v34, %v542_v58 }
 0x6d8   :  { %528 = vrot.lane.b32.xlu0 %v526_v35, %s1533_s13 }
 0x6d9   :  { %550 = vrot.lane.b32.xlu1 %v548_v27, %s1533_s13 }
 0x74a   :  { %v529_v38 = vpop.permute.xlu0 %528 }
 0x74b   :  { %v551_v39 = vpop.permute.xlu1 %550  ;;  %v531_v40 = vadd.f32 %v529_v38, %v521_v36 }
 0x74c   :  { %v553_v41 = vadd.f32 %v551_v39, %v543_v37 }
 0x74d   :  { %1482 = vtanh.f32 %v531_v40 }
 0x74e   :  { %1484 = vtanh.f32 %v553_v41 }
 0x75a   :  { %v1483_v42 = vpop.eup %1482 }
 0x75b   :  { %v1485_v43 = vpop.eup %1484  ;;  %534 = vrot.lane.b32.xlu0 %v1483_v42, %s1532_s3 }
 0x75c   :  { %556 = vrot.lane.b32.xlu1 %v1485_v43, %s1532_s3 }
 0x7cd   :  { %v535_v47 = vpop.permute.xlu0 %534 }
 0x7ce   :  { %v557_v48 = vpop.permute.xlu1 %556  ;;  %v537_v49 = vmul.f32 %v535_v47, %v520_v32 }
 0x7cf   :  { %v559_v50 = vmul.f32 %v557_v48, %v542_v58 }
 0x7d0   :  { %561 = vrot.lane.b32.xlu0 %v537_v49, %s1533_s13 }
 0x7d1   :  { %565 = vrot.lane.b32.xlu1 %v559_v50, %s1532_s3 }
 0x842   :  { %v562_v44 = vpop.permute.xlu0 %561 }
 0x843   :  { %v566_v46 = vpop.permute.xlu1 %565 }
 0x844   :  { %v568_v51 = vsel %vm309_vm4, %v562_v44, %v566_v46 }
 0x845   :  { %1411 = vmatmul.mubr.msk.f32.vlgmr.msra.gmra.mxu0 %vm205_vm5, %v568_v51 }
 0x846   :  { %847 = vmatpush1.msra.mxu0 %v1578_v1  ;;  %894 = vmatprep.mubr.f32.mxu0 %v1530_v3 }
 0x847   :  { %848 = vmatprep.subr.mxu0 %v1583_v2 }
 0x848   :  { %849 = vmatpush1.msra.mxu0 %v1590_v4 }
 0x849   :  { %850 = vmatprep.subr.mxu0 %v1596_v5 }
 0x84a   :  { %851 = vmatpush1.msra.mxu0 %v1602_v6 }
 0x84b   :  { %852 = vmatprep.subr.mxu0 %v1611_v8 }
 0x84c   :  { %853 = vmatpush1.msra.mxu0 %v1620_v10 }
 0x84d   :  { %854 = vmatprep.subr.mxu0 %v1629_v12 }
 0x84e   :  { %855 = vmatpush1.msra.mxu0 %v1638_v14 }
 0x84f   :  { %856 = vmatprep.subr.mxu0 %v1644_v15 }
 0x850   :  { %857 = vmatpush1.msra.mxu0 %v1651_v16 }
 0x851   :  { %858 = vmatprep.subr.mxu0 %v1658_v17 }
 0x852   :  { %859 = vmatpush1.msra.mxu0 %v1665_v18 }
 0x853   :  { %860 = vmatprep.subr.mxu0 %v1672_v19 }
 0x854   :  { %861 = vmatpush1.msra.mxu0 %v1679_v20 }
 0x855   :  { %1104 = vmatprep.subr.mxu0 %v1573_v0 }
 0x905   :  { %v638_v52 = vpop.f32.mrf.mxu0 }
 0x906   :  { %v639_v45 = vadd.f32 %v638_v52, %v1726_v26 }
 0x907   :  { %v640_v53 = vpop.f32.mrf.mxu0 }
 0x908   :  { %v644_v54 = vadd.f32 %v1793_v57, %v639_v45  ;;  %v641_v55 = vadd.f32 %v640_v53, %v1807_v7 }
 0x90a   :  { %v645_v56 = vmul.f32 %v644_v54, %v1737_v33  ;;  %v667_v62 = vmul.f32 %v641_v55, %v1737_v33 }
 0x90c   :  { %1486 = vtanh.f32 %v645_v56 }
 0x90d   :  { %1488 = vtanh.f32 %v667_v62 }
 0x919   :  { %v1487_v9 = vpop.eup %1486 }
 0x91a   :  { %v1489_v11 = vpop.eup %1488  ;;  %v647_v13 = vmul.f32 0.5, %v1487_v9 }
 0x91b   :  { %v669_v21 = vmul.f32 0.5, %v1489_v11 }
 0x91c   :  { %v648_v23 = vadd.f32 0.5, %v647_v13 }
 0x91d   :  { %v670_v24 = vadd.f32 0.5, %v669_v21 }
 0x91e   :  { %v649_v29 = vsel %vm1730_vm3, %v1487_v9, %v648_v23 }
 0x91f   :  { %v671_v57 = vsel %vm1730_vm3, %v1489_v11, %v670_v24  ;;  %652 = vrot.lane.b32.xlu0 %v649_v29, %s1532_s3  ;;  %v650_v58 = vmul.f32 %v649_v29, %v531_v40 }
 0x920   :  { %674 = vrot.lane.b32.xlu1 %v671_v57, %s1532_s3  ;;  %v672_v25 = vmul.f32 %v671_v57, %v553_v41 }
 0x991   :  { %v653_v22 = vpop.permute.xlu0 %652 }
 0x992   :  { %v675_v30 = vpop.permute.xlu1 %674  ;;  %v655_v31 = vmul.f32 %v653_v22, %v649_v29 }
 0x993   :  { %v677_v32 = vmul.f32 %v675_v30, %v671_v57 }
 0x994   :  { %657 = vrot.lane.b32.xlu0 %v655_v31, %s1533_s13 }
 0x995   :  { %679 = vrot.lane.b32.xlu1 %v677_v32, %s1533_s13 }
 0xa06   :  { %v658_v34 = vpop.permute.xlu0 %657 }
 0xa07   :  { %v680_v35 = vpop.permute.xlu1 %679  ;;  %v660_v27 = vadd.f32 %v658_v34, %v650_v58 }
 0xa08   :  { %v682_v36 = vadd.f32 %v680_v35, %v672_v25 }
 0xa09   :  { %1490 = vtanh.f32 %v660_v27 }
 0xa0a   :  { %1492 = vtanh.f32 %v682_v36 }
 0xa16   :  { %v1491_v37 = vpop.eup %1490 }
 0xa17   :  { %v1493_v38 = vpop.eup %1492  ;;  %663 = vrot.lane.b32.xlu0 %v1491_v37, %s1532_s3 }
 0xa18   :  { %685 = vrot.lane.b32.xlu1 %v1493_v38, %s1532_s3 }
 0xa89   :  { %v664_v39 = vpop.permute.xlu0 %663 }
 0xa8a   :  { %v686_v42 = vpop.permute.xlu1 %685  ;;  %v666_v43 = vmul.f32 %v664_v39, %v649_v29 }
 0xa8b   :  { %v688_v47 = vmul.f32 %v686_v42, %v671_v57 }
 0xa8c   :  { %690 = vrot.lane.b32.xlu0 %v666_v43, %s1533_s13 }
 0xa8d   :  { %694 = vrot.lane.b32.xlu1 %v688_v47, %s1532_s3 }
 0xafe   :  { %v691_v40 = vpop.permute.xlu0 %690 }
 0xaff   :  { %v695_v41 = vpop.permute.xlu1 %694 }
 0xb00   :  { %v697_v48 = vsel %vm309_vm4, %v691_v40, %v695_v41 }
 0xb01   :  { %1412 = vmatmul.mubr.msk.f32.vlgmr.msra.gmra.mxu1 %vm205_vm5, %v697_v48 }
 0xb02   :  { %976 = vmatpush1.msra.mxu1 %v1578_v1  ;;  %1023 = vmatprep.mubr.f32.mxu1 %v1530_v3 }
 0xb03   :  { %977 = vmatprep.subr.mxu1 %v1583_v2 }
 0xb04   :  { %978 = vmatpush1.msra.mxu1 %v1590_v4 }
 0xb05   :  { %979 = vmatprep.subr.mxu1 %v1596_v5 }
 0xb06   :  { %980 = vmatpush1.msra.mxu1 %v1602_v6 }
 0xb07   :  { %981 = vmatprep.subr.mxu1 %v1611_v8 }
 0xb08   :  { %982 = vmatpush1.msra.mxu1 %v1620_v10 }
 0xb09   :  { %983 = vmatprep.subr.mxu1 %v1629_v12 }
 0xb0a   :  { %984 = vmatpush1.msra.mxu1 %v1638_v14 }
 0xb0b   :  { %985 = vmatprep.subr.mxu1 %v1644_v15 }
 0xb0c   :  { %986 = vmatpush1.msra.mxu1 %v1651_v16 }
 0xb0d   :  { %987 = vmatprep.subr.mxu1 %v1658_v17 }
 0xb0e   :  { %988 = vmatpush1.msra.mxu1 %v1665_v18 }
 0xb0f   :  { %989 = vmatprep.subr.mxu1 %v1672_v19 }
 0xb10   :  { %990 = vmatpush1.msra.mxu1 %v1679_v20 }
 0xb11   :  { %1233 = vmatprep.subr.mxu1 %v1573_v0 }
 0xbc1   :  { %v767_v49 = vpop.f32.mrf.mxu1 }
 0xbc2   :  { %v768_v50 = vadd.f32 %v767_v49, %v1726_v26 }
 0xbc3   :  { %v769_v44 = vpop.f32.mrf.mxu1 }
 0xbc4   :  { %v773_v46 = vadd.f32 %v768_v50, %v1799_v60  ;;  %v770_v51 = vadd.f32 %v769_v44, %v1807_v7 }
 0xbc6   :  { %v774_v52 = vmul.f32 %v773_v46, %v1737_v33  ;;  %v796_v45 = vmul.f32 %v770_v51, %v1737_v33 }
 0xbc8   :  { %1494 = vtanh.f32 %v774_v52 }
 0xbc9   :  { %1496 = vtanh.f32 %v796_v45 }
 0xbd5   :  { %v1495_v53 = vpop.eup %1494 }
 0xbd6   :  { %v1497_v54 = vpop.eup %1496  ;;  %v776_v55 = vmul.f32 0.5, %v1495_v53 }
 0xbd7   :  { %v798_v56 = vmul.f32 0.5, %v1497_v54 }
 0xbd8   :  { %v777_v62 = vadd.f32 0.5, %v776_v55 }
 0xbd9   :  { %v799_v0 = vadd.f32 0.5, %v798_v56 }
 0xbda   :  { %v778_v9 = vsel %vm1730_vm3, %v1495_v53, %v777_v62 }
 0xbdb   :  { %v800_v60 = vsel %vm1730_vm3, %v1497_v54, %v799_v0  ;;  %781 = vrot.lane.b32.xlu0 %v778_v9, %s1532_s3  ;;  %v779_v24 = vmul.f32 %v778_v9, %v660_v27 }
 0xbdc   :  { %803 = vrot.lane.b32.xlu1 %v800_v60, %s1532_s3  ;;  %v801_v29 = vmul.f32 %v800_v60, %v682_v36 }
 0xc4d   :  { %v782_v11 = vpop.permute.xlu0 %781 }
 0xc4e   :  { %v804_v13 = vpop.permute.xlu1 %803  ;;  %v784_v21 = vmul.f32 %v782_v11, %v778_v9 }
 0xc4f   :  { %v806_v23 = vmul.f32 %v804_v13, %v800_v60 }
 0xc50   :  { %786 = vrot.lane.b32.xlu0 %v784_v21, %s1533_s13 }
 0xc51   :  { %808 = vrot.lane.b32.xlu1 %v806_v23, %s1533_s13 }
 0xcc2   :  { %v787_v57 = vpop.permute.xlu0 %786 }
 0xcc3   :  { %v809_v22 = vpop.permute.xlu1 %808  ;;  %v789_v30 = vadd.f32 %v787_v57, %v779_v24 }
 0xcc4   :  { %v811_v31 = vadd.f32 %v809_v22, %v801_v29 }
 0xcc5   :  { %1498 = vtanh.f32 %v789_v30 }
 0xcc6   :  { %1500 = vtanh.f32 %v811_v31 }
 0xcd2   :  { %v1499_v32 = vpop.eup %1498 }
 0xcd3   :  { %v1501_v58 = vpop.eup %1500  ;;  %792 = vrot.lane.b32.xlu0 %v1499_v32, %s1532_s3 }
 0xcd4   :  { %814 = vrot.lane.b32.xlu1 %v1501_v58, %s1532_s3 }
 0xd45   :  { %v793_v25 = vpop.permute.xlu0 %792 }
 0xd46   :  { %v815_v34 = vpop.permute.xlu1 %814  ;;  %v795_v35 = vmul.f32 %v793_v25, %v778_v9 }
 0xd47   :  { %v817_v37 = vmul.f32 %v815_v34, %v800_v60 }
 0xd48   :  { %819 = vrot.lane.b32.xlu0 %v795_v35, %s1533_s13 }
 0xd49   :  { %823 = vrot.lane.b32.xlu1 %v817_v37, %s1532_s3 }
 0xdba   :  { %v820_v27 = vpop.permute.xlu0 %819 }
 0xdbb   :  { %v824_v36 = vpop.permute.xlu1 %823 }
 0xdbc   :  { %v826_v38 = vsel %vm309_vm4, %v820_v27, %v824_v36 }
 0xdbd   :  { %1413 = vmatmul.mubr.msk.f32.vlgmr.msra.gmra.mxu0 %vm205_vm5, %v826_v38 }
 0xdbe   :  { %1105 = vmatpush1.msra.mxu0 %v1578_v1  ;;  %1152 = vmatprep.mubr.f32.mxu0 %v1530_v3 }
 0xdbf   :  { %1106 = vmatprep.subr.mxu0 %v1583_v2 }
 0xdc0   :  { %1107 = vmatpush1.msra.mxu0 %v1590_v4 }
 0xdc1   :  { %1108 = vmatprep.subr.mxu0 %v1596_v5 }
 0xdc2   :  { %1109 = vmatpush1.msra.mxu0 %v1602_v6 }
 0xdc3   :  { %1110 = vmatprep.subr.mxu0 %v1611_v8 }
 0xdc4   :  { %1111 = vmatpush1.msra.mxu0 %v1620_v10 }
 0xdc5   :  { %1112 = vmatprep.subr.mxu0 %v1629_v12 }
 0xdc6   :  { %1113 = vmatpush1.msra.mxu0 %v1638_v14 }
 0xdc7   :  { %1114 = vmatprep.subr.mxu0 %v1644_v15 }
 0xdc8   :  { %1115 = vmatpush1.msra.mxu0 %v1651_v16 }
 0xdc9   :  { %1116 = vmatprep.subr.mxu0 %v1658_v17 }
 0xdca   :  { %1117 = vmatpush1.msra.mxu0 %v1665_v18 }
 0xdcb   :  { %1118 = vmatprep.subr.mxu0 %v1672_v19 }
 0xdcc   :  { %1119 = vmatpush1.msra.mxu0 %v1679_v20 }
 0xdcd   :  { %1450 = vmatprep.subr.mxu0 %v1530_v3 }
 0xe7d   :  { %v896_v39 = vpop.f32.mrf.mxu0 }
 0xe7e   :  { %v897_v42 = vadd.f32 %v896_v39, %v1726_v26 }
 0xe7f   :  { %v898_v43 = vpop.f32.mrf.mxu0 }
 0xe80   :  { %v902_v47 = vadd.f32 %v1797_v59, %v897_v42  ;;  %v899_v40 = vadd.f32 %v898_v43, %v1807_v7 }
 0xe82   :  { %v903_v41 = vmul.f32 %v902_v47, %v1737_v33  ;;  %v925_v48 = vmul.f32 %v899_v40, %v1737_v33 }
 0xe84   :  { %1502 = vtanh.f32 %v903_v41 }
 0xe85   :  { %1504 = vtanh.f32 %v925_v48 }
 0xe91   :  { %v1503_v49 = vpop.eup %1502 }
 0xe92   :  { %v1505_v50 = vpop.eup %1504  ;;  %v905_v44 = vmul.f32 0.5, %v1503_v49 }
 0xe93   :  { %v927_v46 = vmul.f32 0.5, %v1505_v50 }
 0xe94   :  { %v906_v51 = vadd.f32 0.5, %v905_v44 }
 0xe95   :  { %v928_v52 = vadd.f32 0.5, %v927_v46 }
 0xe96   :  { %v907_v45 = vsel %vm1730_vm3, %v1503_v49, %v906_v51 }
 0xe97   :  { %v929_v59 = vsel %vm1730_vm3, %v1505_v50, %v928_v52  ;;  %910 = vrot.lane.b32.xlu0 %v907_v45, %s1532_s3  ;;  %v908_v62 = vmul.f32 %v907_v45, %v789_v30 }
 0xe98   :  { %932 = vrot.lane.b32.xlu1 %v929_v59, %s1532_s3  ;;  %v930_v0 = vmul.f32 %v929_v59, %v811_v31 }
 0xf09   :  { %v911_v53 = vpop.permute.xlu0 %910 }
 0xf0a   :  { %v933_v54 = vpop.permute.xlu1 %932  ;;  %v913_v55 = vmul.f32 %v911_v53, %v907_v45 }
 0xf0b   :  { %v935_v56 = vmul.f32 %v933_v54, %v929_v59 }
 0xf0c   :  { %915 = vrot.lane.b32.xlu0 %v913_v55, %s1533_s13 }
 0xf0d   :  { %937 = vrot.lane.b32.xlu1 %v935_v56, %s1533_s13 }
 0xf7e   :  { %v916_v9 = vpop.permute.xlu0 %915 }
 0xf7f   :  { %v938_v60 = vpop.permute.xlu1 %937  ;;  %v918_v11 = vadd.f32 %v916_v9, %v908_v62 }
 0xf80   :  { %v940_v13 = vadd.f32 %v938_v60, %v930_v0 }
 0xf81   :  { %1506 = vtanh.f32 %v918_v11 }
 0xf82   :  { %1508 = vtanh.f32 %v940_v13 }
 0xf8e   :  { %v1507_v21 = vpop.eup %1506 }
 0xf8f   :  { %v1509_v23 = vpop.eup %1508  ;;  %921 = vrot.lane.b32.xlu0 %v1507_v21, %s1532_s3 }
 0xf90   :  { %943 = vrot.lane.b32.xlu1 %v1509_v23, %s1532_s3 }
0x1001   :  { %v922_v24 = vpop.permute.xlu0 %921 }
0x1002   :  { %v944_v29 = vpop.permute.xlu1 %943  ;;  %v924_v57 = vmul.f32 %v922_v24, %v907_v45 }
0x1003   :  { %v946_v22 = vmul.f32 %v944_v29, %v929_v59 }
0x1004   :  { %948 = vrot.lane.b32.xlu0 %v924_v57, %s1533_s13 }
0x1005   :  { %952 = vrot.lane.b32.xlu1 %v946_v22, %s1532_s3 }
0x1076   :  { %v949_v30 = vpop.permute.xlu0 %948 }
0x1077   :  { %v953_v31 = vpop.permute.xlu1 %952 }
0x1078   :  { %v955_v32 = vsel %vm309_vm4, %v949_v30, %v953_v31 }
0x1079   :  { %1414 = vmatmul.mubr.msk.f32.vlgmr.msra.gmra.mxu1 %vm205_vm5, %v955_v32 }
0x107a   :  { %1234 = vmatpush1.msra.mxu1 %v1578_v1  ;;  %1281 = vmatprep.mubr.f32.mxu1 %v1530_v3 }
0x107b   :  { %1235 = vmatprep.subr.mxu1 %v1583_v2 }
0x107c   :  { %1236 = vmatpush1.msra.mxu1 %v1590_v4 }
0x107d   :  { %1237 = vmatprep.subr.mxu1 %v1596_v5 }
0x107e   :  { %1238 = vmatpush1.msra.mxu1 %v1602_v6 }
0x107f   :  { %1239 = vmatprep.subr.mxu1 %v1611_v8 }
0x1080   :  { %1240 = vmatpush1.msra.mxu1 %v1620_v10 }
0x1081   :  { %1241 = vmatprep.subr.mxu1 %v1629_v12 }
0x1082   :  { %1242 = vmatpush1.msra.mxu1 %v1638_v14 }
0x1083   :  { %1243 = vmatprep.subr.mxu1 %v1644_v15 }
0x1084   :  { %1244 = vmatpush1.msra.mxu1 %v1651_v16 }
0x1085   :  { %1245 = vmatprep.subr.mxu1 %v1658_v17 }
0x1086   :  { %1246 = vmatpush1.msra.mxu1 %v1665_v18 }
0x1087   :  { %1247 = vmatprep.subr.mxu1 %v1672_v19 }
0x1088   :  { %1248 = vmatpush1.msra.mxu1 %v1679_v20 }
0x1139   :  { %v1025_v1 = vpop.f32.mrf.mxu1 }
0x113a   :  { %v1026_v2 = vadd.f32 %v1025_v1, %v1726_v26 }
0x113b   :  { %v1027_v4 = vpop.f32.mrf.mxu1 }
0x113c   :  { %v1031_v5 = vadd.f32 %v1026_v2, %v1804_v63  ;;  %v1028_v6 = vadd.f32 %v1027_v4, %v1807_v7 }
0x113e   :  { %v1032_v8 = vmul.f32 %v1031_v5, %v1737_v33  ;;  %v1054_v10 = vmul.f32 %v1028_v6, %v1737_v33 }
0x1140   :  { %1510 = vtanh.f32 %v1032_v8 }
0x1141   :  { %1512 = vtanh.f32 %v1054_v10 }
0x114d   :  { %v1511_v12 = vpop.eup %1510 }
0x114e   :  { %v1513_v14 = vpop.eup %1512  ;;  %v1034_v15 = vmul.f32 0.5, %v1511_v12 }
0x114f   :  { %v1056_v16 = vmul.f32 0.5, %v1513_v14 }
0x1150   :  { %v1035_v17 = vadd.f32 0.5, %v1034_v15 }
0x1151   :  { %v1057_v18 = vadd.f32 0.5, %v1056_v16 }
0x1152   :  { %v1036_v19 = vsel %vm1730_vm3, %v1511_v12, %v1035_v17 }
0x1153   :  { %v1058_v20 = vsel %vm1730_vm3, %v1513_v14, %v1057_v18  ;;  %1039 = vrot.lane.b32.xlu0 %v1036_v19, %s1532_s3  ;;  %v1037_v35 = vmul.f32 %v1036_v19, %v918_v11 }
0x1154   :  { %1061 = vrot.lane.b32.xlu1 %v1058_v20, %s1532_s3  ;;  %v1059_v37 = vmul.f32 %v1058_v20, %v940_v13 }
0x11c5   :  { %v1040_v63 = vpop.permute.xlu0 %1039 }
0x11c6   :  { %v1062_v58 = vpop.permute.xlu1 %1061  ;;  %v1042_v25 = vmul.f32 %v1040_v63, %v1036_v19 }
0x11c7   :  { %v1064_v34 = vmul.f32 %v1062_v58, %v1058_v20 }
0x11c8   :  { %1044 = vrot.lane.b32.xlu0 %v1042_v25, %s1533_s13 }
0x11c9   :  { %1066 = vrot.lane.b32.xlu1 %v1064_v34, %s1533_s13 }
0x123a   :  { %v1045_v27 = vpop.permute.xlu0 %1044 }
0x123b   :  { %v1067_v36 = vpop.permute.xlu1 %1066  ;;  %v1047_v38 = vadd.f32 %v1045_v27, %v1037_v35  ;;  %v1309_v27 = vld [vmem:[%s2062_s4] sm:$0xff] }
0x123c   :  { %v1069_v39 = vadd.f32 %v1067_v36, %v1059_v37 }
0x123d   :  { %1514 = vtanh.f32 %v1047_v38 }
0x123e   :  { %1516 = vtanh.f32 %v1069_v39 }
0x124a   :  { %v1515_v42 = vpop.eup %1514 }
0x124b   :  { %v1517_v43 = vpop.eup %1516  ;;  %1050 = vrot.lane.b32.xlu0 %v1515_v42, %s1532_s3 }
0x124c   :  { %1072 = vrot.lane.b32.xlu1 %v1517_v43, %s1532_s3  ;;  %v1417_v43 = vld [vmem:[%s2063_s5] ss:$0 sm:$0xff] }
0x12bd   :  { %v1051_v47 = vpop.permute.xlu0 %1050 }
0x12be   :  { %v1073_v40 = vpop.permute.xlu1 %1072  ;;  %v1053_v41 = vmul.f32 %v1051_v47, %v1036_v19 }
0x12bf   :  { %v1075_v48 = vmul.f32 %v1073_v40, %v1058_v20 }
0x12c0   :  { %1077 = vrot.lane.b32.xlu0 %v1053_v41, %s1533_s13 }
0x12c1   :  { %1081 = vrot.lane.b32.xlu1 %v1075_v48, %s1532_s3 }
0x1332   :  { %v1078_v49 = vpop.permute.xlu0 %1077 }
0x1333   :  { %v1082_v50 = vpop.permute.xlu1 %1081 }
0x1334   :  { %v1084_v44 = vsel %vm309_vm4, %v1078_v49, %v1082_v50 }
0x1335   :  { %1415 = vmatmul.mubr.msk.f32.vlgmr.msra.gmra.mxu0 %vm205_vm5, %v1084_v44 }
0x1336   :  { %1458 = vmatprep.mubr.msk.f32.mxu0 %vm1534_vm6, %v1530_v3 }
0x13f5   :  { %v1154_v46 = vpop.f32.mrf.mxu0 }
0x13f6   :  { %v1155_v51 = vadd.f32 %v1154_v46, %v1726_v26 }
0x13f7   :  { %v1156_v52 = vpop.f32.mrf.mxu0 }
0x13f8   :  { %v1160_v45 = vadd.f32 %v1801_v61, %v1155_v51  ;;  %v1157_v59 = vadd.f32 %v1156_v52, %v1807_v7 }
0x13fa   :  { %v1161_v53 = vmul.f32 %v1160_v45, %v1737_v33  ;;  %v1183_v54 = vmul.f32 %v1157_v59, %v1737_v33 }
0x13fc   :  { %1518 = vtanh.f32 %v1161_v53 }
0x13fd   :  { %1520 = vtanh.f32 %v1183_v54 }
0x1409   :  { %v1519_v55 = vpop.eup %1518 }
0x140a   :  { %v1521_v56 = vpop.eup %1520  ;;  %v1163_v62 = vmul.f32 0.5, %v1519_v55 }
0x140b   :  { %v1185_v0 = vmul.f32 0.5, %v1521_v56 }
0x140c   :  { %v1164_v9 = vadd.f32 0.5, %v1163_v62 }
0x140d   :  { %v1186_v60 = vadd.f32 0.5, %v1185_v0 }
0x140e   :  { %v1165_v26 = vsel %vm1730_vm3, %v1519_v55, %v1164_v9 }
0x140f   :  { %v1187_v61 = vsel %vm1730_vm3, %v1521_v56, %v1186_v60  ;;  %1168 = vrot.lane.b32.xlu0 %v1165_v26, %s1532_s3  ;;  %v1166_v24 = vmul.f32 %v1165_v26, %v1047_v38 }
0x1410   :  { %1190 = vrot.lane.b32.xlu1 %v1187_v61, %s1532_s3  ;;  %v1188_v29 = vmul.f32 %v1187_v61, %v1069_v39 }
0x1481   :  { %v1169_v11 = vpop.permute.xlu0 %1168 }
0x1482   :  { %v1191_v13 = vpop.permute.xlu1 %1190  ;;  %v1171_v21 = vmul.f32 %v1169_v11, %v1165_v26 }
0x1483   :  { %v1193_v23 = vmul.f32 %v1191_v13, %v1187_v61 }
0x1484   :  { %1173 = vrot.lane.b32.xlu0 %v1171_v21, %s1533_s13 }
0x1485   :  { %1195 = vrot.lane.b32.xlu1 %v1193_v23, %s1533_s13 }
0x14f6   :  { %v1174_v57 = vpop.permute.xlu0 %1173 }
0x14f7   :  { %v1196_v22 = vpop.permute.xlu1 %1195  ;;  %v1176_v30 = vadd.f32 %v1174_v57, %v1166_v24 }
0x14f8   :  { %v1198_v31 = vadd.f32 %v1196_v22, %v1188_v29 }
0x14f9   :  { %1522 = vtanh.f32 %v1176_v30 }
0x14fa   :  { %1524 = vtanh.f32 %v1198_v31 }
0x1506   :  { %v1523_v32 = vpop.eup %1522 }
0x1507   :  { %v1525_v1 = vpop.eup %1524  ;;  %1179 = vrot.lane.b32.xlu0 %v1523_v32, %s1532_s3 }
0x1508   :  { %1201 = vrot.lane.b32.xlu1 %v1525_v1, %s1532_s3 }
0x1579   :  { %v1180_v2 = vpop.permute.xlu0 %1179 }
0x157a   :  { %v1202_v4 = vpop.permute.xlu1 %1201  ;;  %v1182_v5 = vmul.f32 %v1180_v2, %v1165_v26 }
0x157b   :  { %v1204_v6 = vmul.f32 %v1202_v4, %v1187_v61 }
0x157c   :  { %1206 = vrot.lane.b32.xlu0 %v1182_v5, %s1533_s13 }
0x157d   :  { %1210 = vrot.lane.b32.xlu1 %v1204_v6, %s1532_s3 }
0x15ee   :  { %v1207_v8 = vpop.permute.xlu0 %1206 }
0x15ef   :  { %v1211_v10 = vpop.permute.xlu1 %1210 }
0x15f0   :  { %v1213_v12 = vsel %vm309_vm4, %v1207_v8, %v1211_v10 }
0x15f1   :  { %1416 = vmatmul.mubr.msk.f32.vlgmr.msra.gmra.mxu1 %vm205_vm5, %v1213_v12 }
0x16b1   :  { %v1283_v14 = vpop.f32.mrf.mxu1 }
0x16b3   :  { %v1284_v15 = vpop.f32.mrf.mxu1 }
0x16b4   :  { %v1285_v16 = vadd.f32 %v1284_v15, %v1807_v7  ;;  %v1311_v7 = vld [vmem:[%s2062_s4 + $0x10] sm:$0xff] }
0x16b6   :  { %v1287_v17 = vmul.f32 %v1285_v16, %v1737_v33  ;;  %v1312_v33 = vld [vmem:[%s2062_s4 + $0x18] sm:$0xff] }
0x16b7   :  { %1451 = vmatpush3.msra.mxu0 %v1312_v33 }
0x16b8   :  { %1526 = vtanh.f32 %v1287_v17  ;;  %1452 = vmatprep.subr.mxu0 %v1530_v3 }
0x16b9   :  { %1453 = vmatpush3.msra.mxu0 %v1311_v7 }
0x16ba   :  { %1454 = vmatprep.subr.mxu0 %v1530_v3 }
0x16bb   :  { %1455 = vmatpush3.msra.mxu0 %v1310_v28 }
0x16bc   :  { %1456 = vmatprep.subr.mxu0 %v1530_v3 }
0x16bd   :  { %1457 = vmatpush3.msra.mxu0 %v1309_v27 }
0x16c5   :  { %v1527_v18 = vpop.eup %1526 }
0x16c6   :  { %v1289_v19 = vmul.f32 0.5, %v1527_v18 }
0x16c8   :  { %v1290_v20 = vadd.f32 0.5, %v1289_v19 }
0x16ca   :  { %v1291_v63 = vsel %vm1730_vm3, %v1527_v18, %v1290_v20 }
0x16cb   :  { %1294 = vrot.lane.b32.xlu0 %v1291_v63, %s1532_s3  ;;  %v1292_v34 = vmul.f32 %v1291_v63, %v1198_v31 }
0x173d   :  { %v1295_v58 = vpop.permute.xlu0 %1294 }
0x173e   :  { %v1297_v25 = vmul.f32 %v1295_v58, %v1291_v63 }
0x1740   :  { %1299 = vrot.lane.b32.xlu1 %v1297_v25, %s1533_s13 }
0x17b2   :  { %v1300_v35 = vpop.permute.xlu1 %1299 }
0x17b3   :  { %v1302_v37 = vadd.f32 %v1300_v35, %v1292_v34 }
0x17b5   :  { %1528 = vtanh.f32 %v1302_v37 }
0x17c2   :  { %v1529_v36 = vpop.eup %1528 }
0x17c3   :  { %1305 = vrot.lane.b32.xlu0 %v1529_v36, %s1532_s3 }
0x1835   :  { %v1306_v38 = vpop.permute.xlu0 %1305 }
0x1836   :  { %v1308_v39 = vmul.f32 %v1306_v38, %v1291_v63 }
0x1838   :  { %1321 = vrot.lane.b32.xlu1 %v1308_v39, %s1533_s13 }
0x18aa   :  { %v1322_v42 = vpop.permute.xlu1 %1321 }
0x18ab   :  { %1459 = vmatmul.mubr.msk.f32.vlgmr.msra.gmra.mxu0 %vm309_vm4, %v1322_v42 }
0x196b   :  { %v1391_v47 = vpop.f32.mrf.mxu0 }
0x196c   :  { %v1392_v40 = vadd.f32 %v1417_v43, %v1391_v47 }
0x196d   :  { %v1460_v41 = vpop.f32.mrf.mxu0 }
0x196e   :  { %1396 = vst.msk [vmem:[%s2064_s6] sm:$0xff] %vm1395_vm7, %v1392_v40 }

</bundles_post_ra>
